<compile_context>
chip_gen: v6e
topology: v6e:2x2x1
jax: 0.10.0
libtpu: 0.0.40
codegen_flags: <defaults>
</compile_context>

<pallas_src>
import math

import jax
import jax.numpy as jnp
from jax.experimental import pallas as pl
from jax.experimental.pallas import tpu as pltpu


def _round_up(x, m):
    return ((x + m - 1) // m) * m


def _pick_ffn_chunk(dp):
    """Largest 128-multiple <= 512 that divides dp (dp is a multiple of 128)."""
    if dp <= 512:
        return dp
    for c in (512, 384, 256, 128):
        if dp % c == 0:
            return c
    return 128


def _make_kernel(*, is_layer_norm, single_kv, d_true, l_true, tk,
                 needs_d_mask, needs_l_mask, ffn_chunk, eps_ln=1e-5):
    """Builds the fused attention + FFN kernel body."""

    def _layer_norm(x, g, b, lane_mask):
        # x: (R, Dp) fp32 with padded lanes == 0.  Mean/var over true width.
        inv_d = 1.0 / float(d_true)
        mu = jnp.sum(x, axis=-1, keepdims=True) * inv_d
        xc = x - mu
        if needs_d_mask:
            xc = xc * lane_mask               # zero padded lanes before variance
        var = jnp.sum(xc * xc, axis=-1, keepdims=True) * inv_d
        return xc * jax.lax.rsqrt(var + eps_ln) * g + b

    def _ffn(x_bf, w1t_ref, b1_ref, w2t_ref, b2_ref):
        # Weights are pre-transposed (in, out) and bf16; fp32 accumulation.
        dp = w1t_ref.shape[0]
        n_chunks = dp // ffn_chunk
        if n_chunks == 1:
            h = jnp.dot(x_bf, w1t_ref[...],
                        preferred_element_type=jnp.float32) + b1_ref[...]
            h = jnp.maximum(h, 0.0)
            return jnp.dot(h.astype(jnp.bfloat16), w2t_ref[...],
                           preferred_element_type=jnp.float32) + b2_ref[...]
        # Large Dp: chunk the hidden dim to bound live ranges of x/h/ffn.
        r = x_bf.shape[0]
        ffn = jnp.zeros((r, dp), jnp.float32) + b2_ref[...]
        for c in range(n_chunks):
            lo = c * ffn_chunk
            hi = lo + ffn_chunk
            h = jnp.dot(x_bf, w1t_ref[:, lo:hi],
                        preferred_element_type=jnp.float32) + b1_ref[:, lo:hi]
            h = jnp.maximum(h, 0.0)
            ffn = ffn + jnp.dot(h.astype(jnp.bfloat16), w2t_ref[lo:hi, :],
                                preferred_element_type=jnp.float32)
        return ffn

    def _epilogue(q32, v_att, w1t_ref, b1_ref, w2t_ref, b2_ref, ln_refs, o_ref):
        bt, tq, dp = q32.shape
        r = bt * tq
        x = (q32 + v_att).reshape(r, dp)       # fp32, lane-dense (R, Dp)

        lane_mask = None
        g = b = None
        if is_layer_norm:
            g = ln_refs[0][...]
            b = ln_refs[1][...]
            if needs_d_mask:
                lane_mask = (jax.lax.broadcasted_iota(
                    jnp.int32, (1, dp), 1) < d_true).astype(jnp.float32)
            x = _layer_norm(x, g, b, lane_mask)

        ffn = _ffn(x.astype(jnp.bfloat16), w1t_ref, b1_ref, w2t_ref, b2_ref)
        out = ffn + x
        if is_layer_norm:
            out = _layer_norm(out, g, b, lane_mask)

        o_ref[...] = out.reshape(bt, tq, dp).astype(o_ref.dtype)

    if single_kv:
        # -------- one KV tile: plain one-pass softmax, no scratch ------------
        def kernel(qbf_ref, q_ref, k_ref, v_ref,
                   w1t_ref, b1_ref, w2t_ref, b2_ref, *rest):
            if is_layer_norm:
                lng_ref, lnb_ref, o_ref = rest
                ln_refs = (lng_ref, lnb_ref)
            else:
                (o_ref,) = rest
                ln_refs = ()

            # bf16 Q (scale folded into K), bf16 K/V streamed straight from HBM.
            s = jnp.einsum("bqd,bkd->bqk", qbf_ref[...], k_ref[...],
                           preferred_element_type=jnp.float32)
            if needs_l_mask:
                pos = jax.lax.broadcasted_iota(jnp.int32, s.shape, 2)
                s = jnp.where(pos < l_true, s, jnp.float32(-1e30))

            m = jnp.max(s, axis=-1, keepdims=True)
            p = jnp.exp(s - m)
            denom = jnp.sum(p, axis=-1, keepdims=True)
            v_att = jnp.einsum("bqk,bkd->bqd", p.astype(jnp.bfloat16), v_ref[...],
                               preferred_element_type=jnp.float32)
            v_att = v_att * pl.reciprocal(denom, approx=True)

            _epilogue(q_ref[...], v_att, w1t_ref, b1_ref, w2t_ref, b2_ref,
                      ln_refs, o_ref)

        return kernel

    # -------- multi KV tile: flash-style online softmax -----------------------
    def kernel(qbf_ref, q_ref, k_ref, v_ref,
               w1t_ref, b1_ref, w2t_ref, b2_ref, *rest):
        if is_layer_norm:
            lng_ref, lnb_ref, o_ref, m_sc, l_sc, acc_sc = rest
            ln_refs = (lng_ref, lnb_ref)
        else:
            o_ref, m_sc, l_sc, acc_sc = rest
            ln_refs = ()

        ki = pl.program_id(2)

        @pl.when(ki == 0)
        def _():
            m_sc[...] = jnp.full_like(m_sc, -jnp.inf)
            l_sc[...] = jnp.zeros_like(l_sc)
            acc_sc[...] = jnp.zeros_like(acc_sc)

        # NT matmul (contract last dims) -> no explicit K transpose.
        s = jnp.einsum("bqd,bkd->bqk", qbf_ref[...], k_ref[...],
                       preferred_element_type=jnp.float32)
        if needs_l_mask:
            # -1e30 (not -inf): a fully-masked tile stays NaN-free.
            pos = ki * tk + jax.lax.broadcasted_iota(jnp.int32, s.shape, 2)
            s = jnp.where(pos < l_true, s, jnp.float32(-1e30))

        m_prev = m_sc[...]
        m_new = jnp.maximum(m_prev, jnp.max(s, axis=-1, keepdims=True))
        alpha = jnp.exp(m_prev - m_new)
        p = jnp.exp(s - m_new)
        l_sc[...] = alpha * l_sc[...] + jnp.sum(p, axis=-1, keepdims=True)
        acc_sc[...] = alpha * acc_sc[...] + jnp.einsum(
            "bqk,bkd->bqd", p.astype(jnp.bfloat16), v_ref[...],
            preferred_element_type=jnp.float32)
        m_sc[...] = m_new

        @pl.when(ki == pl.num_programs(2) - 1)
        def _():
            v_att = acc_sc[...] * pl.reciprocal(l_sc[...], approx=True)
            _epilogue(q_ref[...], v_att, w1t_ref, b1_ref, w2t_ref, b2_ref,
                      ln_refs, o_ref)

    return kernel


def transformer_block(Q, K, V, params, *, is_layer_norm=False):
    """Q, K, V: (B, L, D) float32. Returns (B, L, D) float32."""
    B, L, D = Q.shape
    w1, b1, w2, b2, ln_g, ln_b = params

    # ---- tiling: lane-dense, TQ decoupled from TK (TK divides TQ) -----------
    Dp = _round_up(max(D, 128), 128)
    if L <= 128:
        TQ, TK = 128, 128
    elif L <= 256:
        TQ, TK = 256, 256
    else:
        TQ, TK = 512, 256
    Lp = _round_up(L, TQ)
    Bt = max(1, min(B, 512 // TQ))
    # v7x has 2 TensorCores: keep >= 2 parallel grid steps when B allows it.
    while Bt > 1 and (Lp // TQ) * ((B + Bt - 1) // Bt) < 2:
        Bt = max(1, Bt // 2)
    Bp = _round_up(B, Bt)

    single_kv = (Lp // TK) == 1
    needs_d_mask = Dp != D
    needs_l_mask = Lp != L
    scale = 1.0 / (math.sqrt(max(1.0, float(D))) + 1e-8)
    ffn_chunk = _pick_ffn_chunk(Dp)

    # ---- wrapper-side layout plumbing (zero padding is exact) ---------------
    def pad3(x):
        return jnp.pad(x, ((0, Bp - B), (0, Lp - L), (0, Dp - D)))

    pd = Dp - D
    Qp = pad3(Q)                                        # fp32 Q (residual path)
    Qp_bf = Qp.astype(jnp.bfloat16)                     # bf16 Q (QK^T only)
    Kp_bf = pad3(K * jnp.float32(scale)).astype(jnp.bfloat16)  # scale folded in
    Vp_bf = pad3(V).astype(jnp.bfloat16)
    w1t = jnp.pad(w1, ((0, pd), (0, pd))).T.astype(jnp.bfloat16)  # (in, out)
    w2t = jnp.pad(w2, ((0, pd), (0, pd))).T.astype(jnp.bfloat16)
    b1p = jnp.pad(b1, ((0, 0), (0, pd)))
    b2p = jnp.pad(b2, ((0, 0), (0, pd)))

    kernel = _make_kernel(is_layer_norm=is_layer_norm, single_kv=single_kv,
                          d_true=D, l_true=L, tk=TK,
                          needs_d_mask=needs_d_mask, needs_l_mask=needs_l_mask,
                          ffn_chunk=ffn_chunk)

    if single_kv:
        grid = (Bp // Bt, Lp // TQ)
        q_spec = pl.BlockSpec((Bt, TQ, Dp), lambda b, qi: (b, qi, 0))
        kv_spec = pl.BlockSpec((Bt, TK, Dp), lambda b, qi: (b, 0, 0))
        w_spec = pl.BlockSpec((Dp, Dp), lambda b, qi: (0, 0))
        vec_spec = pl.BlockSpec((1, Dp), lambda b, qi: (0, 0))
        out_spec = pl.BlockSpec((Bt, TQ, Dp), lambda b, qi: (b, qi, 0))
        scratch = []
        dims = ("parallel", "parallel")
    else:
        grid = (Bp // Bt, Lp // TQ, Lp // TK)
        q_spec = pl.BlockSpec((Bt, TQ, Dp), lambda b, qi, ki: (b, qi, 0))
        kv_spec = pl.BlockSpec((Bt, TK, Dp), lambda b, qi, ki: (b, ki, 0))
        w_spec = pl.BlockSpec((Dp, Dp), lambda b, qi, ki: (0, 0))
        vec_spec = pl.BlockSpec((1, Dp), lambda b, qi, ki: (0, 0))
        out_spec = pl.BlockSpec((Bt, TQ, Dp), lambda b, qi, ki: (b, qi, 0))
        scratch = [
            pltpu.VMEM((Bt, TQ, 1), jnp.float32),   # running max
            pltpu.VMEM((Bt, TQ, 1), jnp.float32),   # running denom
            pltpu.VMEM((Bt, TQ, Dp), jnp.float32),  # running numerator
        ]
        dims = ("parallel", "parallel", "arbitrary")

    in_specs = [q_spec, q_spec, kv_spec, kv_spec, w_spec, vec_spec, w_spec, vec_spec]
    args = [Qp_bf, Qp, Kp_bf, Vp_bf, w1t, b1p, w2t, b2p]
    if is_layer_norm:
        in_specs += [vec_spec, vec_spec]
        args += [jnp.pad(ln_g, ((0, 0), (0, pd))),
                 jnp.pad(ln_b, ((0, 0), (0, pd)))]

    out = pl.pallas_call(
        kernel,
        out_shape=jax.ShapeDtypeStruct((Bp, Lp, Dp), Q.dtype),
        grid_spec=pltpu.PrefetchScalarGridSpec(
            num_scalar_prefetch=0,
            grid=grid,
            in_specs=in_specs,
            out_specs=out_spec,
            scratch_shapes=scratch),
        compiler_params=pltpu.CompilerParams(
            dimension_semantics=dims,
            vmem_limit_bytes=64 * 1024 * 1024),
    )(*args)

    return out[:B, :L, :D]


def init_params(key, input_size):
    """Deterministic parameter init mirroring the module's __init__ shapes."""
    D = input_size
    k1, k2, k3, k4 = jax.random.split(key, 4)
    xavier_std = math.sqrt(2.0 / (D + D))
    w1 = xavier_std * jax.random.normal(k1, (D, D), jnp.float32)
    w2 = xavier_std * jax.random.normal(k2, (D, D), jnp.float32)
    bound = 1.0 / math.sqrt(D)
    b1 = jax.random.uniform(k3, (1, D), jnp.float32, -bound, bound)
    b2 = jax.random.uniform(k4, (1, D), jnp.float32, -bound, bound)
    ln_g = jnp.ones((1, D), jnp.float32)
    ln_b = jnp.zeros((1, D), jnp.float32)
    return (w1, b1, w2, b2, ln_g, ln_b)


def transformer_block_ref(Q, K, V, params, *, is_layer_norm=False, eps=1e-8):
    """Pure-JAX fp32 reference matching the PyTorch forward exactly."""
    w1, b1, w2, b2, ln_g, ln_b = params
    dk = max(1.0, Q.shape[-1])
    qk = jnp.einsum("bld,bmd->blm", Q, K) / (math.sqrt(dk) + eps)
    p = jax.nn.softmax(qk, axis=-1)
    v_att = jnp.einsum("blm,bmd->bld", p, V)

    def ln(x):
        mu = jnp.mean(x, axis=-1, keepdims=True)
        var = jnp.mean((x - mu) ** 2, axis=-1, keepdims=True)
        return (x - mu) / jnp.sqrt(var + 1e-5) * ln_g[0] + ln_b[0]

    x = Q + v_att
    if is_layer_norm:
        x = ln(x)
    ffn = jnp.maximum(x @ w1.T + b1[0], 0.0) @ w2.T + b2[0]
    out = ffn + x
    if is_layer_norm:
        out = ln(out)
    return out


if __name__ == "__main__":
    key = jax.random.PRNGKey(0)

    # (B, L, D, is_layer_norm).  Cases 3/4 exercise the multi-KV-tile online
    # softmax (+ seq mask) and the chunked-FFN (Dp > 512) epilogue paths.
    cases = [
        (2, 8, 32, False),
        (2, 8, 32, True),
        (2, 300, 96, True),
        (2, 8, 640, True),
    ]
    for idx, (B, L, D, use_ln) in enumerate(cases):
        kq, kk, kv, kp = jax.random.split(jax.random.fold_in(key, idx), 4)
        Q = jax.random.normal(kq, (B, L, D), jnp.float32)
        K = jax.random.normal(kk, (B, L, D), jnp.float32)
        V = jax.random.normal(kv, (B, L, D), jnp.float32)
        params = init_params(kp, D)

        out = jax.block_until_ready(
            transformer_block(Q, K, V, params, is_layer_norm=use_ln))
        ref = transformer_block_ref(Q, K, V, params, is_layer_norm=use_ln)
        assert out.shape == (B, L, D)
        # bf16 MXU operands with fp32 accumulation -> loosened tolerance.
        err = float(jnp.max(jnp.abs(out - ref)))
        assert jnp.allclose(out, ref, atol=7e-2, rtol=7e-2), (
            f"mismatch vs reference (B={B}, L={L}, D={D}, "
            f"is_layer_norm={use_ln}), max_abs_err={err}")

    print("KERNEL_OK")
</pallas_src>

<mosaic_0001>
module attributes {stable_mosaic.version = 11 : i64} {
  func.func @kernel(%arg0: i32, %arg1: i32, %arg2: memref<1x128x128xbf16, #tpu.memory_space<vmem>>, %arg3: memref<1x128x128xf32, #tpu.memory_space<vmem>>, %arg4: memref<1x128x128xbf16, #tpu.memory_space<vmem>>, %arg5: memref<1x128x128xbf16, #tpu.memory_space<vmem>>, %arg6: memref<128x128xbf16, #tpu.memory_space<vmem>>, %arg7: memref<1x128xf32, #tpu.memory_space<vmem>>, %arg8: memref<128x128xbf16, #tpu.memory_space<vmem>>, %arg9: memref<1x128xf32, #tpu.memory_space<vmem>>, %arg10: memref<1x128x128xf32, #tpu.memory_space<vmem>>) attributes {dimension_semantics = [#tpu.dimension_semantics<parallel>, #tpu.dimension_semantics<parallel>], iteration_bounds = array<i64: 2, 1>, scalar_prefetch = 0 : i64, scratch_operands = 0 : i64, tpu.core_type = #tpu.core_type<tc>, window_params = [{transform_indices = @transform_0, window_bounds = array<i64: 1, 128, 128>}, {transform_indices = @transform_1, window_bounds = array<i64: 1, 128, 128>}, {transform_indices = @transform_2, window_bounds = array<i64: 1, 128, 128>}, {transform_indices = @transform_3, window_bounds = array<i64: 1, 128, 128>}, {pipeline_mode = #tpu.pipeline_mode<synchronous>, transform_indices = @transform_4, window_bounds = array<i64: 128, 128>}, {pipeline_mode = #tpu.pipeline_mode<synchronous>, transform_indices = @transform_5, window_bounds = array<i64: 1, 128>}, {pipeline_mode = #tpu.pipeline_mode<synchronous>, transform_indices = @transform_6, window_bounds = array<i64: 128, 128>}, {pipeline_mode = #tpu.pipeline_mode<synchronous>, transform_indices = @transform_7, window_bounds = array<i64: 1, 128>}, {transform_indices = @transform_8, window_bounds = array<i64: 1, 128, 128>}]} {
    %c0 = arith.constant 0 : index
    %c0_0 = arith.constant 0 : index
    %c0_1 = arith.constant 0 : index
    %0 = vector.load %arg2[%c0, %c0_0, %c0_1] : memref<1x128x128xbf16, #tpu.memory_space<vmem>>, vector<1x128x128xbf16>
    %c0_2 = arith.constant 0 : index
    %c0_3 = arith.constant 0 : index
    %c0_4 = arith.constant 0 : index
    %1 = vector.load %arg4[%c0_2, %c0_3, %c0_4] : memref<1x128x128xbf16, #tpu.memory_space<vmem>>, vector<1x128x128xbf16>
    "tpu.trace_start"() <{level = 10 : i32, message = "bqd,bkd->bqk"}> : () -> ()
    %cst = arith.constant dense<0.000000e+00> : vector<1x128x128xf32>
    %2 = tpu.matmul %0, %1, %cst {dimension_numbers = #tpu.dot_dimension_numbers<[2], [2], [1], [1], [0, 0, 0, 1, 1, 1], [0], [0]>} : vector<1x128x128xbf16>, vector<1x128x128xbf16>, vector<1x128x128xf32> -> vector<1x128x128xf32>
    "tpu.trace_stop"() : () -> ()
    %3 = tpu.iota {dimensions = array<i32: 2>} : vector<1x128x128xi32>
    %c8_i32 = arith.constant 8 : i32
    %4 = vector.broadcast %c8_i32 : i32 to vector<1x128x128xi32>
    %5 = arith.cmpi slt, %3, %4 : vector<1x128x128xi32>
    %cst_5 = arith.constant -1.000000e+30 : f32
    %6 = vector.broadcast %cst_5 : f32 to vector<1x128x128xf32>
    %7 = arith.select %5, %2, %6 : vector<1x128x128xi1>, vector<1x128x128xf32>
    %cst_6 = arith.constant dense<0xFF800000> : vector<1x128xf32>
    %8 = vector.multi_reduction <maximumf>, %7, %cst_6 [2] : vector<1x128x128xf32> to vector<1x128xf32>
    %9 = vector.shape_cast %8 : vector<1x128xf32> to vector<1x128x1xf32>
    %10 = vector.broadcast %9 : vector<1x128x1xf32> to vector<1x128x128xf32>
    %11 = arith.subf %7, %10 : vector<1x128x128xf32>
    %12 = math.exp %11 : vector<1x128x128xf32>
    %cst_7 = arith.constant dense<0.000000e+00> : vector<1x128xf32>
    %13 = vector.multi_reduction <add>, %12, %cst_7 [2] : vector<1x128x128xf32> to vector<1x128xf32>
    %14 = vector.shape_cast %13 : vector<1x128xf32> to vector<1x128x1xf32>
    %15 = arith.truncf %12 : vector<1x128x128xf32> to vector<1x128x128xbf16>
    %c0_8 = arith.constant 0 : index
    %c0_9 = arith.constant 0 : index
    %c0_10 = arith.constant 0 : index
    %16 = vector.load %arg5[%c0_8, %c0_9, %c0_10] : memref<1x128x128xbf16, #tpu.memory_space<vmem>>, vector<1x128x128xbf16>
    "tpu.trace_start"() <{level = 10 : i32, message = "bqk,bkd->bqd"}> : () -> ()
    %cst_11 = arith.constant dense<0.000000e+00> : vector<1x128x128xf32>
    %17 = tpu.matmul %15, %16, %cst_11 {dimension_numbers = #tpu.dot_dimension_numbers<[2], [1], [1], [2], [0, 0, 0, 1, 1, 2], [0], [0]>} : vector<1x128x128xbf16>, vector<1x128x128xbf16>, vector<1x128x128xf32> -> vector<1x128x128xf32>
    "tpu.trace_stop"() : () -> ()
    %18 = tpu.reciprocal %14 {approx = true} : vector<1x128x1xf32> -> vector<1x128x1xf32>
    %19 = vector.broadcast %18 : vector<1x128x1xf32> to vector<1x128x128xf32>
    %20 = arith.mulf %17, %19 : vector<1x128x128xf32>
    %c0_12 = arith.constant 0 : index
    %c0_13 = arith.constant 0 : index
    %c0_14 = arith.constant 0 : index
    %21 = vector.load %arg3[%c0_12, %c0_13, %c0_14] : memref<1x128x128xf32, #tpu.memory_space<vmem>>, vector<1x128x128xf32>
    %22 = arith.addf %21, %20 : vector<1x128x128xf32>
    %23 = vector.shape_cast %22 : vector<1x128x128xf32> to vector<128x128xf32>
    %24 = arith.truncf %23 : vector<128x128xf32> to vector<128x128xbf16>
    %c0_15 = arith.constant 0 : index
    %c0_16 = arith.constant 0 : index
    %25 = vector.load %arg6[%c0_15, %c0_16] : memref<128x128xbf16, #tpu.memory_space<vmem>>, vector<128x128xbf16>
    %cst_17 = arith.constant dense<0.000000e+00> : vector<128x128xf32>
    %26 = tpu.matmul %24, %25, %cst_17 {dimension_numbers = #tpu.dot_dimension_numbers<[1], [0], [0], [1], [0, 0, 1, 1], [], []>} : vector<128x128xbf16>, vector<128x128xbf16>, vector<128x128xf32> -> vector<128x128xf32>
    %c0_18 = arith.constant 0 : index
    %c0_19 = arith.constant 0 : index
    %27 = vector.load %arg7[%c0_18, %c0_19] : memref<1x128xf32, #tpu.memory_space<vmem>>, vector<1x128xf32>
    %28 = vector.broadcast %27 : vector<1x128xf32> to vector<128x128xf32>
    %29 = arith.addf %26, %28 : vector<128x128xf32>
    %cst_20 = arith.constant 0.000000e+00 : f32
    %30 = vector.broadcast %cst_20 : f32 to vector<128x128xf32>
    %31 = arith.maximumf %29, %30 : vector<128x128xf32>
    %32 = arith.truncf %31 : vector<128x128xf32> to vector<128x128xbf16>
    %c0_21 = arith.constant 0 : index
    %c0_22 = arith.constant 0 : index
    %33 = vector.load %arg8[%c0_21, %c0_22] : memref<128x128xbf16, #tpu.memory_space<vmem>>, vector<128x128xbf16>
    %cst_23 = arith.constant dense<0.000000e+00> : vector<128x128xf32>
    %34 = tpu.matmul %32, %33, %cst_23 {dimension_numbers = #tpu.dot_dimension_numbers<[1], [0], [0], [1], [0, 0, 1, 1], [], []>} : vector<128x128xbf16>, vector<128x128xbf16>, vector<128x128xf32> -> vector<128x128xf32>
    %c0_24 = arith.constant 0 : index
    %c0_25 = arith.constant 0 : index
    %35 = vector.load %arg9[%c0_24, %c0_25] : memref<1x128xf32, #tpu.memory_space<vmem>>, vector<1x128xf32>
    %36 = vector.broadcast %35 : vector<1x128xf32> to vector<128x128xf32>
    %37 = arith.addf %34, %36 : vector<128x128xf32>
    %38 = arith.addf %37, %23 : vector<128x128xf32>
    %39 = vector.shape_cast %38 : vector<128x128xf32> to vector<1x128x128xf32>
    %c0_26 = arith.constant 0 : index
    %c0_27 = arith.constant 0 : index
    %c0_28 = arith.constant 0 : index
    %40 = vector.load %arg10[%c0_26, %c0_27, %c0_28] : memref<1x128x128xf32, #tpu.memory_space<vmem>>, vector<1x128x128xf32>
    tpu.vector_store %arg10[%c0_26, %c0_27, %c0_28], %39 {strides = array<i32>} : memref<1x128x128xf32, #tpu.memory_space<vmem>>, vector<1x128x128xf32>,
    return
  }
  func.func @transform_0(%arg0: i32, %arg1: i32) -> (i32, i32, i32) {
    %c0_i32 = arith.constant 0 : i32
    %c0_i32_0 = arith.constant 0 : i32
    return %arg0, %arg1, %c0_i32 : i32, i32, i32
  }
  func.func @transform_1(%arg0: i32, %arg1: i32) -> (i32, i32, i32) {
    %c0_i32 = arith.constant 0 : i32
    %c0_i32_0 = arith.constant 0 : i32
    return %arg0, %arg1, %c0_i32 : i32, i32, i32
  }
  func.func @transform_2(%arg0: i32, %arg1: i32) -> (i32, i32, i32) {
    %c0_i32 = arith.constant 0 : i32
    %c0_i32_0 = arith.constant 0 : i32
    %c0_i32_1 = arith.constant 0 : i32
    return %arg0, %c0_i32, %c0_i32_0 : i32, i32, i32
  }
  func.func @transform_3(%arg0: i32, %arg1: i32) -> (i32, i32, i32) {
    %c0_i32 = arith.constant 0 : i32
    %c0_i32_0 = arith.constant 0 : i32
    %c0_i32_1 = arith.constant 0 : i32
    return %arg0, %c0_i32, %c0_i32_0 : i32, i32, i32
  }
  func.func @transform_4(%arg0: i32, %arg1: i32) -> (i32, i32) {
    %c0_i32 = arith.constant 0 : i32
    %c0_i32_0 = arith.constant 0 : i32
    %c0_i32_1 = arith.constant 0 : i32
    return %c0_i32, %c0_i32_0 : i32, i32
  }
  func.func @transform_5(%arg0: i32, %arg1: i32) -> (i32, i32) {
    %c0_i32 = arith.constant 0 : i32
    %c0_i32_0 = arith.constant 0 : i32
    %c0_i32_1 = arith.constant 0 : i32
    return %c0_i32, %c0_i32_0 : i32, i32
  }
  func.func @transform_6(%arg0: i32, %arg1: i32) -> (i32, i32) {
    %c0_i32 = arith.constant 0 : i32
    %c0_i32_0 = arith.constant 0 : i32
    %c0_i32_1 = arith.constant 0 : i32
    return %c0_i32, %c0_i32_0 : i32, i32
  }
  func.func @transform_7(%arg0: i32, %arg1: i32) -> (i32, i32) {
    %c0_i32 = arith.constant 0 : i32
    %c0_i32_0 = arith.constant 0 : i32
    %c0_i32_1 = arith.constant 0 : i32
    return %c0_i32, %c0_i32_0 : i32, i32
  }
  func.func @transform_8(%arg0: i32, %arg1: i32) -> (i32, i32, i32) {
    %c0_i32 = arith.constant 0 : i32
    %c0_i32_0 = arith.constant 0 : i32
    return %arg0, %arg1, %c0_i32 : i32, i32, i32
  }
}

</mosaic_0001>

<bundles_post_ra>
// kernel: tpu_custom_call.1
= control target key start
LH: loop header
LB: loop body
LE: loop exit
PB: predicated region body
PF: predicated region fallthrough
CT: control target
= control target key end

     0   :  { %s3055_s0 = inlined_call_operand.hbm [shape: bf16[2,128,128], index: 0, kind: input, shape index: {}]   ;;  %s3056_s1 = inlined_call_operand.hbm [shape: f32[2,128,128], index: 1, kind: input, shape index: {}]   ;;  %s3057_s2 = inlined_call_operand.hbm [shape: bf16[2,128,128], index: 2, kind: input, shape index: {}]   ;;  %s3058_s3 = inlined_call_operand.hbm [shape: bf16[2,128,128], index: 3, kind: input, shape index: {}]   ;;  %s3059_s4 = inlined_call_operand.hbm [shape: bf16[128,128], index: 4, kind: input, shape index: {}]   ;;  %s3060_s5 = inlined_call_operand.vmem [shape: f32[1,128], index: 5, kind: input, shape index: {}]   ;;  %s3061_s6 = inlined_call_operand.hbm [shape: bf16[128,128], index: 6, kind: input, shape index: {}]   ;;  %s3062_s7 = inlined_call_operand.vmem [shape: f32[1,128], index: 7, kind: input, shape index: {}]   ;;  %s3063_s8 = inlined_call_operand.hbm [shape: f32[2,128,128], index: 8, kind: output, shape index: {}]  }
   0x1   :  { %3076 = sst [smem:[#allocation25_spill]] %s3055_s0 }
   0x2   :  { %3077 = sst [smem:[#allocation26_spill]] %s3056_s1 }
   0x3   :  { %3078 = sst [smem:[#allocation27_spill]] %s3057_s2 }
   0x4   :  { %3079 = sst [smem:[#allocation28_spill]] %s3059_s4 }
   0x5   :  { %3080 = sst [smem:[#allocation29_spill]] %s3063_s8 }
   0x6   :  { %13 = vsyncpa [#allocation3], 0 }
   0x7   :  { %15 = vsyncpa [#allocation3 + $0x1], 0 }
   0x8   :  { %16 = vsyncpa [#allocation6], 0 }
   0x9   :  { %18 = vsyncpa [#allocation6 + $0x1], 0 }
   0xa   :  { %19 = vsyncpa [#allocation9], 0 }
   0xb   :  { %21 = vsyncpa [#allocation9 + $0x1], 0 }
   0xc   :  { %22 = vsyncpa [#allocation12], 0 }
   0xd   :  { %23 = vsyncpa [#allocation4], 0 }
   0xe   :  { %25 = vsyncpa [#allocation4 + $0x1], 0  ;;  %s2490_s27 = smov 0   ;;  %s2492_s28 = smov 0  }
   0xf   :  { %s2494_s29 = smov 0   ;;  %s2496_s30 = smov 0  }
  0x10   :  { %s2498_s9 = smov 0   ;;  %s2500_s10 = smov 0  }
  0x11 LB: > { %3081 = sst [smem:[#allocation20_spill]] %s2410_s27  ;;  %s2521_s11 = sadd.s32 4294967295, %s2430_s10   ;;  %s2430_s10 = sphi %s2500_s10, %s31_s10   ;;  %s2426_s9 = sphi %s2498_s9, %s3119_s9   ;;  %s2422_s30 = sphi %s2496_s30, %s3118_s30   ;;  %s2418_s29 = sphi %s2494_s29, %s3117_s29   ;;  %s2414_s28 = sphi %s2492_s28, %s3116_s28   ;;  %s2410_s27 = sphi %s2490_s27, %s3115_s27  }
  0x12   : > { %3082 = sst [smem:[#allocation21_spill]] %s2422_s30  ;;  %s1677_s12 = sadd.s32 4294967294, %s2430_s10  }
  0x13   : > { %p59_p0 = scmp.ne.s32.totalorder %s2418_s29, %s2414_s28  ;;  %p60_p1 = scmp.eq.s32.totalorder %s2430_s10, 0 }
  0x14   : > { %p65_p2 = scmp.ne.s32.totalorder %s2414_s28, %s2410_s27  ;;  %p3064_p3 = scmp.eq.s32.totalorder %s2521_s11, 0 }
  0x15   : > { %p255_p4 = scmp.eq.s32.totalorder %s2521_s11, 1  ;;  %p2532_p5 = por %p60_p1, %p59_p0 }
  0x16   : > { %p261_p6 = scmp.eq.s32.totalorder %s1677_s12, 1  ;;  %p2538_p7 = por %p3064_p3, %p65_p2 }
  0x17   : > { %p2542_p8 = por %p255_p4, %p59_p0  ;;  %p1678_p10 = scmp.ge.s32.totalorder %s2430_s10, 1 }
  0x18   : > { %p2546_p9 = por %p261_p6, %p65_p2  ;;  %p268_p11 = scmp.lt.s32.totalorder %s2430_s10, 3 }
  0x19   : > { %s3085_s16 = scalar_select %p2542_p8, 1, 0 }
  0x1a   : > { %s3087_s17 = scalar_select %p2546_p9, 1, 0 }
  0x1b   : > { %3086 = sst [smem:[#allocation22_spill]] %s3085_s16  ;;  %p2552_p12 = pnand %p1678_p10, %p268_p11 }
  0x1c   : > { %3088 = sst [smem:[#allocation23_spill]] %s3087_s17  ;;  %s2432_s19 = smov [#allocation10]  }
  0x1d   : > { %s280_s20 = sshll.u32 %s2432_s19, 4  ;;  %p1980_p13 = pneg %p2552_p12  ;;  %s281_s20 = int_to_ptr.vmem [resolvable:$true] %s280_s20 }
  0x1e   : > { %s43_s22 = sadd.s32 1, %s2426_s9  ;;  %s2568_s23 = sand.u32 1, %s2418_s29  }
  0x1f   : > { %p2562_p4 = pnand %p1980_p13, %p3064_p3  ;;  %p2570_p2 = scmp.ge.s32.totalorder %s43_s22, 2 }
  0x20   : > { %s2181_s25 = scalar_lea.vmem %s281_s20, 1024  ;;  %p2189_p0 = scmp.lt.s32.totalorder %s281_s20, %s281_s20 }
  0x21   : > { %p2172_p6 = pneg %p2562_p4  ;;  %p2182_p10 = scmp.ne.s32.totalorder %s281_s20, %s2181_s25 }
  0x22   : > { %p2190_p3 = scmp.lt.s32.totalorder %s2181_s25, %s2181_s25 }
  0x23   : > { %p2184_p11 = pnand %p2182_p10, %p2172_p6 }
  0x24   : > { %p2191_p1 = por %p2190_p3, %p2189_p0 }
  0x25   : > { %p2185_p13 = pneg %p2184_p11 }
  0x27   : > { %p2192_p9 = pnand %p2191_p1, %p2185_p13 }
  0x29   : > { %2195 = shalt.err (!%p2192_p9)
}
  0x2a   : > { %s3070_s26 = smov 64   ;;  %s3072_s12 = smov 4  }
  0x2b   : > { %s3092_s4 = sld [smem:[#allocation28_spill]]  ;;  %s3121_s22 = smov (%p2570_p2, %s43_s22), 0 }
  0x2c   : > { %3093 = sst [smem:[#allocation24_spill]] %s3121_s22  ;;  %p3094_p3 = scmp.lt.s32.totalorder %s2430_s10, 2 }
  0x2d   : > { %s3075_s17 = sand.u32 1, %s2430_s10   ;;  %s47_s27 = ssub.s32 %s2426_s9, %s3121_s22 }
  0x2e   : > { %p2595_p9 = pnand %p3094_p3, %p2532_p5  ;;  %p50_p0 = scmp.eq.s32.totalorder %s47_s27, 0 }
  0x2f   : > { %s1685_s8 = sshll.u32 %s2568_s23, 7  ;;  %s1750_s16 = sshll.u32 %s2426_s9, 11 }
  0x30   : > { %s3096_s30 = sadd.s32 1, %s2418_s29  ;;  %s3097_s1 = sld [smem:[#allocation26_spill]] }
  0x31   : > { %1983 = dma.hbm_to_vmem [thread:$0]  (!%p2562_p4), %s3092_s4, 1024, %s281_s20, [#allocation9], %s3070_s26, %s3070_s26, %s3072_s12  }
  0x32   : > { %s2607_s19 = scalar_select %p50_p0, %s2418_s29, %s3096_s30  }
  0x33   : > { %s340_s25 = scalar_lea.vmem [#allocation5], %s1685_s8  ;;  %s2614_s12 = scalar_lea.sflag [#allocation6], %s3075_s17 }
  0x34   : > { %s349_s26 = sshll.u32 %s340_s25, 4  ;;  %p2198_p5 = pneg %p2595_p9  ;;  %s350_s26 = int_to_ptr.vmem [resolvable:$true] %s349_s26 }
  0x35   : > { %s2209_s4 = scalar_lea.vmem %s350_s26, 2048  ;;  %s2435_s27 = smov [#allocation5]  }
  0x36   : > { %s348_s14 = scalar_lea.hbm %s3097_s1, %s1750_s16  ;;  %p2210_p1 = scmp.ne.s32.totalorder %s350_s26, %s2209_s4 }
  0x37   : > { %s2214_s30 = sshll.u32 %s2435_s27, 4  ;;  %s2215_s30 = int_to_ptr.vmem [resolvable:$false] %s2214_s30 }
  0x38   : > { %p2212_p2 = pnand %p2210_p1, %p2198_p5  ;;  %s2216_s22 = scalar_lea.vmem %s2215_s30, 4096 }
  0x39   : > { %p2217_p11 = scmp.lt.s32.totalorder %s350_s26, %s2215_s30  ;;  %p2218_p13 = scmp.lt.s32.totalorder %s2216_s22, %s2209_s4 }
  0x3a   : > { %p2213_p10 = pneg %p2212_p2 }
  0x3b   : > { %p2219_p3 = por %p2218_p13, %p2217_p11 }
  0x3d   : > { %p2220_p0 = pnand %p2219_p3, %p2213_p10 }
  0x3f   : > { %2223 = shalt.err (!%p2220_p0)
}
  0x40   : > { %s2436_s8 = smov 128   ;;  %s2437_s16 = smov 8  }
  0x41   : > { %1993 = dma.hbm_to_vmem [thread:$0]  (!%p2595_p9), %s348_s14, 2048, %s350_s26, %s2614_s12, %s2436_s8, %s2436_s8, %s2437_s16  }
  0x42   : > { %s2438_s20 = smov [#allocation11]   ;;  %s2625_s25 = sshll.u32 %s2568_s23, 6 }
  0x43   : > { %s296_s24 = sshll.u32 %s2438_s20, 4  ;;  %s297_s24 = int_to_ptr.vmem [resolvable:$true] %s296_s24 }
  0x44   : > { %s2235_s27 = scalar_lea.vmem %s297_s24, 1024  ;;  %p2243_p11 = scmp.lt.s32.totalorder %s297_s24, %s297_s24 }
  0x45   : > { %p2236_p1 = scmp.ne.s32.totalorder %s297_s24, %s2235_s27  ;;  %p2244_p13 = scmp.lt.s32.totalorder %s2235_s27, %s2235_s27 }
  0x47   : > { %p2238_p2 = pnand %p2236_p1, %p2172_p6  ;;  %p2245_p3 = por %p2244_p13, %p2243_p11 }
  0x49   : > { %p2239_p10 = pneg %p2238_p2 }
  0x4b   : > { %p2246_p0 = pnand %p2245_p3, %p2239_p10 }
  0x4d   : > { %2249 = shalt.err (!%p2246_p0)
}
  0x4e   : > { %s3098_s4 = smov 4   ;;  %s3099_s22 = smov 64  }
  0x4f   : > { %1986 = dma.hbm_to_vmem [thread:$0]  (!%p2562_p4), %s3061_s6, 1024, %s297_s24, [#allocation12], %s3099_s22, %s3099_s22, %s3098_s4  }
  0x50   : > { %s2639_s30 = sshll.u32 %s2426_s9, 10  ;;  %s3100_s0 = sld [smem:[#allocation25_spill]] }
  0x51   : > { %s317_s27 = scalar_lea.vmem [#allocation2], %s2625_s25  ;;  %s314_s17 = scalar_lea.sflag [#allocation3], %s2568_s23 }
  0x52   : > { %s326_s21 = sshll.u32 %s317_s27, 4  ;;  %s2439_s26 = smov [#allocation2]   ;;  %s327_s21 = int_to_ptr.vmem [resolvable:$true] %s326_s21 }
  0x53   : > { %s2263_s1 = scalar_lea.vmem %s327_s21, 1024  ;;  %s2268_s14 = sshll.u32 %s2439_s26, 4  ;;  %s2269_s14 = int_to_ptr.vmem [resolvable:$false] %s2268_s14 }
  0x54   : > { %p2264_p6 = scmp.ne.s32.totalorder %s327_s21, %s2263_s1  ;;  %s2270_s24 = scalar_lea.vmem %s2269_s14, 2048 }
  0x55   : > { %p2271_p4 = scmp.lt.s32.totalorder %s327_s21, %s2269_s14  ;;  %p2272_p10 = scmp.lt.s32.totalorder %s2270_s24, %s2263_s1 }
  0x56   : > { %s325_s20 = scalar_lea.hbm %s3100_s0, %s2639_s30  ;;  %p2266_p1 = pnand %p2264_p6, %p2198_p5 }
  0x57   : > { %p2273_p11 = por %p2272_p10, %p2271_p4 }
  0x58   : > { %p2267_p2 = pneg %p2266_p1 }
  0x5a   : > { %p2274_p13 = pnand %p2273_p11, %p2267_p2 }
  0x5c   : > { %2277 = shalt.err (!%p2274_p13)
}
  0x5d   : > { %1990 = dma.hbm_to_vmem [thread:$0]  (!%p2595_p9), %s325_s20, 1024, %s327_s21, %s314_s17, %s3099_s22, %s3099_s22, %s3098_s4  }
  0x5e   : > { %s3101_s2 = sld [smem:[#allocation27_spill]]  ;;  %s363_s27 = scalar_lea.vmem [#allocation7], %s2625_s25 }
  0x5f   : > { %s370_s26 = sshll.u32 %s363_s27, 4  ;;  %s2440_s14 = smov [#allocation7]   ;;  %s371_s26 = int_to_ptr.vmem [resolvable:$true] %s370_s26 }
  0x60   : > { %s2291_s1 = scalar_lea.vmem %s371_s26, 1024  ;;  %s2296_s24 = sshll.u32 %s2440_s14, 4  ;;  %s2297_s24 = int_to_ptr.vmem [resolvable:$false] %s2296_s24 }
  0x61   : > { %p2292_p3 = scmp.ne.s32.totalorder %s371_s26, %s2291_s1  ;;  %s2298_s0 = scalar_lea.vmem %s2297_s24, 2048 }
  0x62   : > { %p2299_p1 = scmp.lt.s32.totalorder %s371_s26, %s2297_s24  ;;  %p2300_p2 = scmp.lt.s32.totalorder %s2298_s0, %s2291_s1 }
  0x63   : > { %p2294_p0 = pnand %p2292_p3, %p2198_p5 }
  0x64   : > { %s369_s16 = scalar_lea.hbm %s3101_s2, %s2639_s30  ;;  %p2301_p4 = por %p2300_p2, %p2299_p1 }
  0x65   : > { %p2295_p6 = pneg %p2294_p0 }
  0x67   : > { %p2302_p10 = pnand %p2301_p4, %p2295_p6 }
  0x69   : > { %2305 = shalt.err (!%p2302_p10)
}
  0x6a   : > { %1996 = dma.hbm_to_vmem [thread:$0]  (!%p2595_p9), %s369_s16, 1024, %s371_s26, %s2614_s12, %s3099_s22, %s3099_s22, %s3098_s4  }
  0x6b   : > { %s390_s21 = scalar_lea.hbm %s3058_s3, %s2639_s30  ;;  %s384_s23 = scalar_lea.vmem [#allocation8], %s2625_s25 }
  0x6c   : > { %s391_s0 = sshll.u32 %s384_s23, 4  ;;  %s3102_s8 = sand.u32 1, %s2430_s10   ;;  %s392_s0 = int_to_ptr.vmem [resolvable:$true] %s391_s0 }
  0x6d   : > { %s381_s27 = scalar_lea.sflag [#allocation9], %s3102_s8  ;;  %s2319_s1 = scalar_lea.vmem %s392_s0, 1024 }
  0x6e   : > { %p2320_p11 = scmp.ne.s32.totalorder %s392_s0, %s2319_s1  ;;  %s2441_s14 = smov [#allocation8]  }
  0x6f   : > { %s2324_s24 = sshll.u32 %s2441_s14, 4  ;;  %s2325_s24 = int_to_ptr.vmem [resolvable:$false] %s2324_s24 }
  0x70   : > { %p2322_p13 = pnand %p2320_p11, %p2198_p5  ;;  %s2326_s2 = scalar_lea.vmem %s2325_s24, 2048 }
  0x71   : > { %p2327_p0 = scmp.lt.s32.totalorder %s392_s0, %s2325_s24  ;;  %p2328_p6 = scmp.lt.s32.totalorder %s2326_s2, %s2319_s1 }
  0x72   : > { %p2323_p3 = pneg %p2322_p13 }
  0x73   : > { %p2329_p1 = por %p2328_p6, %p2327_p0 }
  0x75   : > { %p2330_p2 = pnand %p2329_p1, %p2323_p3 }
  0x77   : > { %2333 = shalt.err (!%p2330_p2)
}
  0x78   : > { %1999 = dma.hbm_to_vmem [thread:$0]  (!%p2595_p9), %s390_s21, 1024, %s392_s0, %s381_s27, %s3099_s22, %s3099_s22, %s3098_s4  }
  0x79   : > { %403 = sbr.rel (%p2552_p12) target bundleno = 1220 (0x4c4), region = 52  ;;  %s2687_s12 = sand.u32 (!%p2552_p12), 1, %s2414_s28  }
  0x7a   : > { %s1695_s25 = sshll.u32 (!%p2552_p12), %s2687_s12, 6  ;;  %s406_s2 = scalar_lea.sflag (!%p2552_p12), [#allocation3], %s2687_s12 }
  0x7b   : > { %s2691_s30 = scalar_lea.vmem (!%p2552_p12), [#allocation2], %s1695_s25 }
  0x7e   : > { %2385 = dma.done.wait (%p2538_p7), %s406_s2, 1024  }
  0x7f   : > { %2387 = vsyncadd (%p2538_p7), %s406_s2, 4294966272  ;;  %s414_s13 = sand.u32 1, %s2521_s11   ;;  %s1696_s18 = sshll.u32 %s2687_s12, 7 }
  0x80   : > { %s415_s4 = scalar_lea.sflag [#allocation6], %s414_s13  ;;  %s2701_s22 = scalar_lea.vmem [#allocation5], %s1696_s18 }
  0x81   : > { %2389 = dma.done.wait (%p2538_p7), %s415_s4, 3072  }
  0x82   : > { %2391 = vsyncadd (%p2538_p7), %s415_s4, 4294964224  ;;  %s2707_s16 = scalar_lea.vmem [#allocation7], %s1695_s25  ;;  %s433_s26 = scalar_lea.sflag [#allocation9], %s414_s13 }
  0x83   : > { %s2709_s17 = scalar_lea.vmem [#allocation8], %s1695_s25 }
  0x84   : > { %2393 = dma.done.wait (%p2538_p7), %s433_s26, 1024  }
  0x85   : > { %2395 = vsyncadd (%p2538_p7), %s433_s26, 4294966272  ;;  %p3103_p12 = scmp.eq.s32.totalorder %s2521_s11, 0 }
  0x87   : > { %2397 = dma.done.wait (%p3103_p12), [#allocation9], 1024   ;;  %p3104_p9 = pmov %p3103_p12 }
  0x89   : > { %2399 = vsyncadd (%p3104_p9), [#allocation9], 4294966272  ;;  %p3105_p5 = pmov %p3104_p9 }
  0x8b   : > { %2401 = dma.done.wait (%p3105_p5), [#allocation12], 1024   ;;  %p3106_p4 = pmov %p3105_p5 }
  0x8c   : > { %v2066_v0 = vld [vmem:[%s2707_s16 + $0x38] sm:$0xff]   ;;  %v2067_v1 = vld [vmem:[%s2707_s16 + $0x30] sm:$0xff]   ;;  %v2068_v2 = vld [vmem:[%s2707_s16 + $0x28] sm:$0xff]   ;;  %v721_v18 = vlaneseq  ;;  %s2953_s23 = scalar_lea.vmem [#allocation13], %s1696_s18  ;;  %s3107_s0 = sld [smem:[#allocation21_spill]] }
  0x8d   : > { %2403 = vsyncadd (%p3106_p4), [#allocation12], 4294966272  ;;  %1818 = vmatprep.subr.bf16.mxu0 %v2066_v0  ;;  %v2074_v3 = vld [vmem:[%s2691_s30] sm:$0xff]   ;;  %v2070_v5 = vld [vmem:[%s2707_s16 + $0x18] sm:$0xff]   ;;  %s1501_s1 = sshll.u32 %s2953_s23, 4  ;;  %s3109_s25 = sld [smem:[#allocation29_spill]]  ;;  %s3004_s1 = int_to_ptr.vmem [resolvable:$true] %s1501_s1 }
  0x8e   : > { %1819 = vmatpush3.bf16.xpose.msra.mxu0 %v2066_v0  ;;  %1834 = vmatprep.mubr.bf16.mxu0 %v2074_v3  ;;  %v2069_v4 = vld [vmem:[%s2707_s16 + $0x20] sm:$0xff]   ;;  %v2071_v6 = vld [vmem:[%s2707_s16 + $0x10] sm:$0xff]   ;;  %v2072_v7 = vld [vmem:[%s2707_s16 + $0x8] sm:$0xff]   ;;  %v2741_v19 = vand.u32 127, %v721_v18  ;;  %s2334_s13 = scalar_lea.vmem %s3004_s1, 2048  ;;  %s2442_s18 = smov [#allocation13]  }
  0x8f   : > { %1820 = vmatprep.subr.bf16.mxu0 %v2067_v1  ;;  %v2073_v8 = vld [vmem:[%s2707_s16] sm:$0xff]   ;;  %v2075_v9 = vld [vmem:[%s2691_s30 + $0x8] sm:$0xff]   ;;  %v2076_v10 = vld [vmem:[%s2691_s30 + $0x10] sm:$0xff]   ;;  %p2335_p7 = scmp.ne.s32.totalorder %s3004_s1, %s2334_s13  ;;  %s2338_s4 = sshll.u32 %s2442_s18, 4  ;;  %s2339_s4 = int_to_ptr.vmem [resolvable:$false] %s2338_s4 }
  0x90   : > { %v2077_v11 = vld [vmem:[%s2691_s30 + $0x18] sm:$0xff]   ;;  %v2078_v12 = vld [vmem:[%s2691_s30 + $0x20] sm:$0xff]   ;;  %v2079_v13 = vld [vmem:[%s2691_s30 + $0x28] sm:$0xff]   ;;  %vm723_vm0 = vcmp.lt.s32.totalorder %v2741_v19, 8  ;;  %p2341_p13 = scmp.lt.s32.totalorder %s3004_s1, %s2339_s4 }
  0x91   : > { %v2080_v14 = vld [vmem:[%s2691_s30 + $0x30] sm:$0xff]   ;;  %v2081_v15 = vld [vmem:[%s2691_s30 + $0x38] sm:$0xff]   ;;  %v2084_v32 = vld [vmem:[%s2709_s17 + $0x28] sm:$0xff]   ;;  %s1486_s30 = scalar_lea.sflag [#allocation4], %s2687_s12  ;;  %p2336_p10 = pnand %p2335_p7, %p2542_p8 }
  0x92   : > { %v2082_v16 = vld [vmem:[%s2709_s17 + $0x38] sm:$0xff]   ;;  %v2083_v17 = vld [vmem:[%s2709_s17 + $0x30] sm:$0xff]   ;;  %v2085_v37 = vld [vmem:[%s2709_s17 + $0x20] sm:$0xff]   ;;  %s1753_s27 = sshll.u32 %s3107_s0, 11 }
  0x93   : > { %1850 = vmatprep.subr.bf16.mxu1 %v2082_v16  ;;  %v2086_v42 = vld [vmem:[%s2709_s17 + $0x18] sm:$0xff]   ;;  %v2087_v48 = vld [vmem:[%s2709_s17 + $0x10] sm:$0xff]   ;;  %v2088_v53 = vld [vmem:[%s2709_s17 + $0x8] sm:$0xff]   ;;  %s3002_s2 = scalar_lea.hbm %s3109_s25, %s1753_s27  ;;  %p2337_p11 = pneg %p2336_p10 }
  0x94   : > { %1851 = vmatpush3.bf16.msra.mxu1 %v2082_v16  ;;  %v2089_v56 = vld [vmem:[%s2709_s17] sm:$0xff]  }
  0x95   : > { %1852 = vmatprep.subr.bf16.mxu1 %v2083_v17 }
  0x96   : > { %1821 = vmatpush3.bf16.xpose.msra.mxu0 %v2067_v1 }
  0x97   : > { %1822 = vmatprep.subr.bf16.mxu0 %v2068_v2 }
  0x98   : > { %1853 = vmatpush3.bf16.msra.mxu1 %v2083_v17 }
  0x99   : > { %1854 = vmatprep.subr.bf16.mxu1 %v2084_v32 }
  0x9c   : > { %1855 = vmatpush3.bf16.msra.mxu1 %v2084_v32 }
  0x9d   : > { %1856 = vmatprep.subr.bf16.mxu1 %v2085_v37 }
  0x9e   : > { %1823 = vmatpush3.bf16.xpose.msra.mxu0 %v2068_v2 }
  0x9f   : > { %1824 = vmatprep.subr.bf16.mxu0 %v2069_v4 }
  0xa0   : > { %1857 = vmatpush3.bf16.msra.mxu1 %v2085_v37 }
  0xa1   : > { %1858 = vmatprep.subr.bf16.mxu1 %v2086_v42 }
  0xa4   : > { %1859 = vmatpush3.bf16.msra.mxu1 %v2086_v42 }
  0xa5   : > { %1860 = vmatprep.subr.bf16.mxu1 %v2087_v48 }
  0xa6   : > { %1825 = vmatpush3.bf16.xpose.msra.mxu0 %v2069_v4 }
  0xa7   : > { %1826 = vmatprep.subr.bf16.mxu0 %v2070_v5 }
  0xa8   : > { %1861 = vmatpush3.bf16.msra.mxu1 %v2087_v48 }
  0xa9   : > { %1862 = vmatprep.subr.bf16.mxu1 %v2088_v53 }
  0xac   : > { %1863 = vmatpush3.bf16.msra.mxu1 %v2088_v53 }
  0xad   : > { %1864 = vmatprep.subr.bf16.mxu1 %v2089_v56 }
  0xae   : > { %1827 = vmatpush3.bf16.xpose.msra.mxu0 %v2070_v5 }
  0xaf   : > { %1828 = vmatprep.subr.bf16.mxu0 %v2071_v6 }
  0xb0   : > { %1865 = vmatpush3.bf16.msra.mxu1 %v2089_v56 }
  0xb6   : > { %1829 = vmatpush3.bf16.xpose.msra.mxu0 %v2071_v6 }
  0xb7   : > { %1830 = vmatprep.subr.bf16.mxu0 %v2072_v7 }
  0xbe   : > { %1831 = vmatpush3.bf16.xpose.msra.mxu0 %v2072_v7 }
  0xbf   : > { %1832 = vmatprep.subr.bf16.mxu0 %v2073_v8 }
  0xc6   : > { %1833 = vmatpush3.bf16.xpose.msra.mxu0 %v2073_v8 }
  0xcd   : > { %1835 = vmatmul.mubr.bf16.vlgmr.msra.gmra.mxu0 %v2075_v9 }
  0xce   : > { %1838 = vmatprep.mubr.bf16.mxu0 %v2076_v10 }
  0xd5   : > { %1839 = vmatmul.mubr.bf16.gmra.mxu0 %v2077_v11 }
  0xd6   : > { %1842 = vmatprep.mubr.bf16.mxu0 %v2078_v12 }
  0xdd   : > { %1843 = vmatmul.mubr.bf16.gmra.mxu0 %v2079_v13 }
  0xde   : > { %1846 = vmatprep.mubr.bf16.mxu0 %v2080_v14 }
  0xe5   : > { %1847 = vmatmul.mubr.bf16.gmra.mxu0 %v2081_v15 }
 0x18d   : > { %v1836_v20 = vpop.f32.mrf.mxu0 }
 0x18e   : > { %v2746_v21 = vsel %vm723_vm0, %v1836_v20, -1e+30 }
 0x18f   : > { %744 = vmax.xlane.f32.xlu1 %v2746_v21  ;;  %v658_v22 = vpop.f32.mrf.mxu0 }
 0x190   : > { %v2751_v23 = vsel %vm723_vm0, %v658_v22, -1e+30 }
 0x191   : > { %740 = vmax.xlane.f32.xlu0 %v2751_v23  ;;  %v1837_v24 = vpop.f32.mrf.mxu0 }
 0x192   : > { %v2756_v25 = vsel %vm723_vm0, %v1837_v24, -1e+30 }
 0x193   : > { %746 = vmax.xlane.f32.xlu1 %v2756_v25  ;;  %v661_v26 = vpop.f32.mrf.mxu0 }
 0x194   : > { %v2761_v27 = vsel %vm723_vm0, %v661_v26, -1e+30 }
 0x195   : > { %742 = vmax.xlane.f32.xlu0 %v2761_v27  ;;  %v1840_v28 = vpop.f32.mrf.mxu0 }
 0x196   : > { %v2772_v34 = vsel %vm723_vm0, %v1840_v28, -1e+30 }
 0x197   : > { %v674_v29 = vpop.f32.mrf.mxu0 }
 0x198   : > { %v2766_v30 = vsel %vm723_vm0, %v674_v29, -1e+30 }
 0x199   : > { %748 = vmax.xlane.f32.xlu0 %v2766_v30  ;;  %v1841_v31 = vpop.f32.mrf.mxu0 }
 0x19a   : > { %v2783_v39 = vsel %vm723_vm0, %v1841_v31, -1e+30 }
 0x19b   : > { %v677_v33 = vpop.f32.mrf.mxu0 }
 0x19c   : > { %v2776_v35 = vsel %vm723_vm0, %v677_v33, -1e+30 }
 0x19d   : > { %752 = vmax.xlane.f32.xlu0 %v2772_v34  ;;  %750 = vmax.xlane.f32.xlu1 %v2776_v35  ;;  %v1844_v36 = vpop.f32.mrf.mxu0 }
 0x19e   : > { %v2794_v44 = vsel %vm723_vm0, %v1844_v36, -1e+30 }
 0x19f   : > { %v690_v38 = vpop.f32.mrf.mxu0 }
 0x1a0   : > { %v2787_v40 = vsel %vm723_vm0, %v690_v38, -1e+30 }
 0x1a1   : > { %754 = vmax.xlane.f32.xlu1 %v2783_v39  ;;  %756 = vmax.xlane.f32.xlu0 %v2787_v40  ;;  %v1845_v41 = vpop.f32.mrf.mxu0 }
 0x1a2   : > { %v2805_v49 = vsel %vm723_vm0, %v1845_v41, -1e+30 }
 0x1a3   : > { %v693_v43 = vpop.f32.mrf.mxu0 }
 0x1a4   : > { %v2798_v45 = vsel %vm723_vm0, %v693_v43, -1e+30 }
 0x1a5   : > { %760 = vmax.xlane.f32.xlu0 %v2794_v44  ;;  %758 = vmax.xlane.f32.xlu1 %v2798_v45  ;;  %v1848_v46 = vpop.f32.mrf.mxu0 }
 0x1a6   : > { %v2816_v54 = vsel %vm723_vm0, %v1848_v46, -1e+30 }
 0x1a7   : > { %v706_v47 = vpop.f32.mrf.mxu0 }
 0x1a8   : > { %v2809_v50 = vsel %vm723_vm0, %v706_v47, -1e+30 }
 0x1a9   : > { %762 = vmax.xlane.f32.xlu1 %v2805_v49  ;;  %764 = vmax.xlane.f32.xlu0 %v2809_v50  ;;  %v1849_v51 = vpop.f32.mrf.mxu0 }
 0x1aa   : > { %v2827_v57 = vsel %vm723_vm0, %v1849_v51, -1e+30 }
 0x1ab   : > { %v709_v52 = vpop.f32.mrf.mxu0 }
 0x1ac   : > { %v2820_v55 = vsel %vm723_vm0, %v709_v52, -1e+30 }
 0x1ad   : > { %768 = vmax.xlane.f32.xlu0 %v2816_v54  ;;  %766 = vmax.xlane.f32.xlu1 %v2820_v55 }
 0x1b1   : > { %770 = vmax.xlane.f32.xlu1 %v2827_v57 }
 0x218   : > { %v745_v58 = vpop.xlane.xlu1 %744 }
 0x219   : > { %v774_v59 = vsub.f32 %v2746_v21, %v745_v58 }
 0x21a   : > { %v741_v60 = vpop.xlane.xlu0 %740 }
 0x21b   : > { %v772_v61 = vsub.f32 %v2751_v23, %v741_v60  ;;  %v792_v63 = vmul.f32 1.442695, %v774_v59 }
 0x21c   : > { %v747_v62 = vpop.xlane.xlu1 %746 }
 0x21d   : > { %v788_v0 = vmul.f32 1.442695, %v772_v61  ;;  %v775_v1 = vsub.f32 %v2756_v25, %v747_v62 }
 0x21e   : > { %v743_v2 = vpop.xlane.xlu0 %742 }
 0x21f   : > { %2106 = vpow2.f32 %v788_v0  ;;  %v794_v3 = vmul.f32 1.442695, %v775_v1  ;;  %v773_v4 = vsub.f32 %v2761_v27, %v743_v2  ;;  %v2090_v2 = vld [vmem:[#allocation10 + $0x38] sm:$0xff]  }
 0x220   : > { %2108 = vpow2.f32 %v792_v63  ;;  %1882 = vmatprep.subr.bf16.mxu1 %v2090_v2 }
 0x221   : > { %v790_v5 = vmul.f32 1.442695, %v773_v4  ;;  %2110 = vpow2.f32 %v794_v3  ;;  %v2091_v3 = vld [vmem:[#allocation10 + $0x30] sm:$0xff]   ;;  %v2092_v4 = vld [vmem:[#allocation10 + $0x28] sm:$0xff]  }
 0x222   : > { %v749_v6 = vpop.xlane.xlu0 %748 }
 0x223   : > { %2112 = vpow2.f32 %v790_v5  ;;  %v776_v7 = vsub.f32 %v2766_v30, %v749_v6  ;;  %v2093_v5 = vld [vmem:[#allocation10 + $0x20] sm:$0xff]   ;;  %v2094_v6 = vld [vmem:[#allocation10 + $0x18] sm:$0xff]  }
 0x225   : > { %v796_v8 = vmul.f32 1.442695, %v776_v7  ;;  %v2095_v7 = vld [vmem:[#allocation10 + $0x10] sm:$0xff]  }
 0x226   : > { %v753_v9 = vpop.xlane.xlu0 %752  ;;  %v751_v10 = vpop.xlane.xlu1 %750 }
 0x227   : > { %2114 = vpow2.f32 %v796_v8  ;;  %v778_v11 = vsub.f32 %v2772_v34, %v753_v9  ;;  %v777_v12 = vsub.f32 %v2776_v35, %v751_v10  ;;  %v2096_v8 = vld [vmem:[#allocation10 + $0x8] sm:$0xff]   ;;  %v2097_v9 = vld [vmem:[#allocation10] sm:$0xff]   ;;  %v2846_v10 = vld [vmem:[#allocation11 + $0x38] sm:$0xff]  }
 0x228   : > { %1914 = vmatprep.subr.bf16.mxu0 %v2846_v10 }
 0x229   : > { %v800_v13 = vmul.f32 1.442695, %v778_v11  ;;  %v798_v14 = vmul.f32 1.442695, %v777_v12  ;;  %v2848_v11 = vld [vmem:[#allocation11 + $0x30] sm:$0xff]   ;;  %1915 = vmatpush3.bf16.msra.mxu0 %v2846_v10  ;;  %v2854_v12 = vld [vmem:[#allocation11 + $0x28] sm:$0xff]  }
 0x22a   : > { %v755_v15 = vpop.xlane.xlu1 %754  ;;  %v757_v16 = vpop.xlane.xlu0 %756  ;;  %1916 = vmatprep.subr.bf16.mxu0 %v2848_v11 }
 0x22b   : > { %2116 = vpow2.f32 %v800_v13  ;;  %v779_v17 = vsub.f32 %v2783_v39, %v755_v15  ;;  %v780_v18 = vsub.f32 %v2787_v40, %v757_v16  ;;  %v2858_v13 = vld [vmem:[#allocation11 + $0x20] sm:$0xff]  }
 0x22c   : > { %v2107_v19 = vpop.eup %2106  ;;  %2118 = vpow2.f32 %v798_v14  ;;  %v2862_v14 = vld [vmem:[#allocation11 + $0x18] sm:$0xff]  }
 0x22d   : > { %v802_v20 = vmul.f32 1.442695, %v779_v17  ;;  %v804_v21 = vmul.f32 1.442695, %v780_v18  ;;  %820 = vadd.xlane.f32.xlu0 %v2107_v19  ;;  %v2109_v22 = vpop.eup %2108  ;;  %1917 = vmatpush3.bf16.msra.mxu0 %v2848_v11 }
 0x22e   : > { %v761_v23 = vpop.xlane.xlu0 %760  ;;  %v759_v24 = vpop.xlane.xlu1 %758  ;;  %1918 = vmatprep.subr.bf16.mxu0 %v2854_v12 }
 0x22f   : > { %v2111_v25 = vpop.eup %2110  ;;  %2120 = vpow2.f32 %v802_v20  ;;  %v782_v26 = vsub.f32 %v2794_v44, %v761_v23  ;;  %v781_v27 = vsub.f32 %v2798_v45, %v759_v24 }
 0x230   : > { %v2113_v28 = vpop.eup %2112  ;;  %2122 = vpow2.f32 %v804_v21  ;;  %v853_v34 = vpack.c.bf16 %v2111_v25, %v2109_v22 }
 0x231   : > { %v808_v29 = vmul.f32 1.442695, %v782_v26  ;;  %v806_v30 = vmul.f32 1.442695, %v781_v27  ;;  %824 = vadd.xlane.f32.xlu0 %v2109_v22  ;;  %822 = vadd.xlane.f32.xlu1 %v2113_v28  ;;  %v852_v31 = vpack.c.bf16 %v2113_v28, %v2107_v19 }
 0x232   : > { %v763_v32 = vpop.xlane.xlu1 %762  ;;  %v765_v33 = vpop.xlane.xlu0 %764  ;;  %1919 = vmatpush3.bf16.msra.mxu0 %v2854_v12 }
 0x233   : > { %2124 = vpow2.f32 %v808_v29  ;;  %v783_v35 = vsub.f32 %v2805_v49, %v763_v32  ;;  %v784_v36 = vsub.f32 %v2809_v50, %v765_v33  ;;  %1866 = vmatprep.mubr.bf16.mxu1 %v852_v31  ;;  %1920 = vmatprep.subr.bf16.mxu0 %v2858_v13 }
 0x234   : > { %v2115_v37 = vpop.eup %2114  ;;  %2126 = vpow2.f32 %v806_v30  ;;  %1867 = vmatmul.mubr.bf16.vlgmr.msra.gmra.mxu1 %v853_v34 }
 0x235   : > { %v810_v38 = vmul.f32 1.442695, %v783_v35  ;;  %v812_v39 = vmul.f32 1.442695, %v784_v36  ;;  %828 = vadd.xlane.f32.xlu0 %v2115_v37  ;;  %826 = vadd.xlane.f32.xlu1 %v2111_v25  ;;  %v1056_v35 = vld [vmem:[%s2701_s22 + $0x18] sm:$0xff] }
 0x236   : > { %v769_v40 = vpop.xlane.xlu0 %768  ;;  %v767_v41 = vpop.xlane.xlu1 %766  ;;  %1883 = vmatpush3.bf16.msra.mxu1 %v2090_v2  ;;  %1921 = vmatpush3.bf16.msra.mxu0 %v2858_v13  ;;  %v1058_v2 = vld [vmem:[%s2701_s22 + $0x28] sm:$0xff] }
 0x237   : > { %2128 = vpow2.f32 %v810_v38  ;;  %v786_v42 = vsub.f32 %v2816_v54, %v769_v40  ;;  %v785_v43 = vsub.f32 %v2820_v55, %v767_v41  ;;  %1884 = vmatprep.subr.bf16.mxu1 %v2091_v3  ;;  %1922 = vmatprep.subr.bf16.mxu0 %v2862_v14  ;;  %v1053_v38 = vld [vmem:[%s2701_s22] sm:$0xff]  ;;  %v1054_v40 = vld [vmem:[%s2701_s22 + $0x8] sm:$0xff]  ;;  %v1055_v41 = vld [vmem:[%s2701_s22 + $0x10] sm:$0xff] }
 0x238   : > { %v2117_v44 = vpop.eup %2116  ;;  %2130 = vpow2.f32 %v812_v39 }
 0x239   : > { %v2119_v45 = vpop.eup %2118  ;;  %v816_v46 = vmul.f32 1.442695, %v786_v42  ;;  %v814_v47 = vmul.f32 1.442695, %v785_v43  ;;  %832 = vadd.xlane.f32.xlu0 %v2117_v44 }
 0x23a   : > { %830 = vadd.xlane.f32.xlu1 %v2119_v45  ;;  %v771_v48 = vpop.xlane.xlu1 %770  ;;  %v854_v49 = vpack.c.bf16 %v2119_v45, %v2115_v37  ;;  %1885 = vmatpush3.bf16.msra.mxu1 %v2091_v3  ;;  %v1059_v3 = vld [vmem:[%s2701_s22 + $0x30] sm:$0xff] }
 0x23b   : > { %2132 = vpow2.f32 %v816_v46  ;;  %v787_v50 = vsub.f32 %v2827_v57, %v771_v48  ;;  %1886 = vmatprep.subr.bf16.mxu1 %v2092_v4  ;;  %1923 = vmatpush3.bf16.msra.mxu0 %v2862_v14 }
 0x23c   : > { %v2121_v51 = vpop.eup %2120  ;;  %2134 = vpow2.f32 %v814_v47  ;;  %1870 = vmatprep.mubr.bf16.mxu1 %v854_v49 }
 0x23d   : > { %v2123_v52 = vpop.eup %2122  ;;  %v818_v53 = vmul.f32 1.442695, %v787_v50  ;;  %v855_v54 = vpack.c.bf16 %v2121_v51, %v2117_v44 }
 0x23e   : > { %836 = vadd.xlane.f32.xlu0 %v2123_v52  ;;  %834 = vadd.xlane.f32.xlu1 %v2121_v51 }
 0x23f   : > { %2136 = vpow2.f32 %v818_v53  ;;  %1871 = vmatmul.mubr.bf16.gmra.mxu1 %v855_v54 }
 0x240   : > { %v2125_v55 = vpop.eup %2124  ;;  %1887 = vmatpush3.bf16.msra.mxu1 %v2092_v4 }
 0x241   : > { %v2127_v56 = vpop.eup %2126  ;;  %1888 = vmatprep.subr.bf16.mxu1 %v2093_v5 }
 0x242   : > { %840 = vadd.xlane.f32.xlu0 %v2125_v55  ;;  %838 = vadd.xlane.f32.xlu1 %v2127_v56  ;;  %v856_v58 = vpack.c.bf16 %v2127_v56, %v2123_v52 }
 0x244   : > { %v2129_v59 = vpop.eup %2128  ;;  %1874 = vmatprep.mubr.bf16.mxu1 %v856_v58  ;;  %1889 = vmatpush3.bf16.msra.mxu1 %v2093_v5 }
 0x245   : > { %v2131_v60 = vpop.eup %2130  ;;  %v857_v61 = vpack.c.bf16 %v2129_v59, %v2125_v55  ;;  %1890 = vmatprep.subr.bf16.mxu1 %v2094_v6 }
 0x246   : > { %844 = vadd.xlane.f32.xlu0 %v2131_v60  ;;  %842 = vadd.xlane.f32.xlu1 %v2129_v59 }
 0x247   : > { %1875 = vmatmul.mubr.bf16.gmra.mxu1 %v857_v61 }
 0x248   : > { %v2133_v57 = vpop.eup %2132  ;;  %1891 = vmatpush3.bf16.msra.mxu1 %v2094_v6 }
 0x249   : > { %v2135_v62 = vpop.eup %2134  ;;  %1892 = vmatprep.subr.bf16.mxu1 %v2095_v7 }
 0x24a   : > { %848 = vadd.xlane.f32.xlu0 %v2133_v57  ;;  %846 = vadd.xlane.f32.xlu1 %v2135_v62  ;;  %v858_v63 = vpack.c.bf16 %v2135_v62, %v2131_v60 }
 0x24c   : > { %v2137_v0 = vpop.eup %2136  ;;  %1878 = vmatprep.mubr.bf16.mxu1 %v858_v63  ;;  %1893 = vmatpush3.bf16.msra.mxu1 %v2095_v7 }
 0x24d   : > { %v859_v1 = vpack.c.bf16 %v2137_v0, %v2133_v57  ;;  %1894 = vmatprep.subr.bf16.mxu1 %v2096_v8  ;;  %v1060_v57 = vld [vmem:[%s2701_s22 + $0x38] sm:$0xff] }
 0x24e   : > { %850 = vadd.xlane.f32.xlu1 %v2137_v0  ;;  %v1057_v0 = vld [vmem:[%s2701_s22 + $0x20] sm:$0xff] }
 0x24f   : > { %1879 = vmatmul.mubr.bf16.gmra.mxu1 %v859_v1 }
 0x250   : > { %1895 = vmatpush3.bf16.msra.mxu1 %v2096_v8 }
 0x251   : > { %1896 = vmatprep.subr.bf16.mxu1 %v2097_v9 }
 0x254   : > { %1897 = vmatpush3.bf16.msra.mxu1 %v2097_v9 }
 0x255   : > { %1946 = vmatprep.subr.bf16.mxu1 %v2846_v10 }
 0x2b6   : > { %v821_v16 = vpop.xlane.xlu0 %820 }
 0x2b7   : > { %2138 = vrcp.f32 %v821_v16 }
 0x2ba   : > { %v823_v15 = vpop.xlane.xlu1 %822  ;;  %v825_v18 = vpop.xlane.xlu0 %824 }
 0x2be   : > { %v827_v17 = vpop.xlane.xlu1 %826  ;;  %v829_v20 = vpop.xlane.xlu0 %828 }
 0x2bf   : > { %2140 = vrcp.f32 %v827_v17 }
 0x2c0   : > { %2142 = vrcp.f32 %v825_v18 }
 0x2c1   : > { %2144 = vrcp.f32 %v823_v15 }
 0x2c2   : > { %v833_v22 = vpop.xlane.xlu0 %832  ;;  %2146 = vrcp.f32 %v829_v20 }
 0x2c3   : > { %v831_v19 = vpop.xlane.xlu1 %830 }
 0x2c4   : > { %v2139_v27 = vpop.eup %2138 }
 0x2c7   : > { %v835_v21 = vpop.xlane.xlu1 %834  ;;  %v837_v24 = vpop.xlane.xlu0 %836 }
 0x2c8   : > { %2148 = vrcp.f32 %v835_v21 }
 0x2c9   : > { %2150 = vrcp.f32 %v833_v22  ;;  %v1064_v22 = vld [vmem:[%s2701_s22 + $0x58] sm:$0xff] }
 0x2ca   : > { %2152 = vrcp.f32 %v831_v19 }
 0x2cb   : > { %v839_v23 = vpop.xlane.xlu1 %838  ;;  %v841_v30 = vpop.xlane.xlu0 %840  ;;  %2154 = vrcp.f32 %v837_v24 }
 0x2cc   : > { %v2141_v29 = vpop.eup %2140 }
 0x2cd   : > { %v2143_v32 = vpop.eup %2142 }
 0x2ce   : > { %v2145_v36 = vpop.eup %2144 }
 0x2cf   : > { %v843_v28 = vpop.xlane.xlu1 %842  ;;  %v845_v47 = vpop.xlane.xlu0 %844 }
 0x2d0   : > { %2156 = vrcp.f32 %v843_v28  ;;  %v2147_v53 = vpop.eup %2146  ;;  %v1063_v28 = vld [vmem:[%s2701_s22 + $0x50] sm:$0xff] }
 0x2d1   : > { %2158 = vrcp.f32 %v841_v30 }
 0x2d2   : > { %2160 = vrcp.f32 %v839_v23 }
 0x2d3   : > { %v847_v44 = vpop.xlane.xlu1 %846  ;;  %v849_v59 = vpop.xlane.xlu0 %848  ;;  %2162 = vrcp.f32 %v845_v47 }
 0x2d5   : > { %v2149_v54 = vpop.eup %2148 }
 0x2d6   : > { %v2151_v58 = vpop.eup %2150 }
 0x2d7   : > { %v851_v55 = vpop.xlane.xlu1 %850  ;;  %v2153_v62 = vpop.eup %2152 }
 0x2d8   : > { %2164 = vrcp.f32 %v851_v55  ;;  %v2155_v15 = vpop.eup %2154 }
 0x2d9   : > { %2166 = vrcp.f32 %v849_v59 }
 0x2da   : > { %2168 = vrcp.f32 %v847_v44 }
 0x2dd   : > { %v2157_v17 = vpop.eup %2156 }
 0x2de   : > { %v2159_v19 = vpop.eup %2158 }
 0x2df   : > { %v2161_v23 = vpop.eup %2160 }
 0x2f4   : > { %v1868_v25 = vpop.f32.mrf.mxu1 }
 0x2f5   : > { %v1039_v37 = vmul.f32 %v2143_v32, %v1868_v25  ;;  %v1061_v25 = vld [vmem:[%s2701_s22 + $0x40] sm:$0xff] }
 0x2f6   : > { %v958_v26 = vpop.f32.mrf.mxu1 }
 0x2f7   : > { %v1037_v33 = vmul.f32 %v2139_v27, %v958_v26  ;;  %v2877_v48 = vadd.f32 %v1055_v41, %v1039_v37  ;;  %v1062_v27 = vld [vmem:[%s2701_s22 + $0x48] sm:$0xff] }
 0x2f8   : > { %v1869_v31 = vpop.f32.mrf.mxu1 }
 0x2f9   : > { %v1040_v34 = vmul.f32 %v2141_v29, %v1869_v31  ;;  %v2873_v45 = vadd.f32 %v1053_v38, %v1037_v33 }
 0x2fa   : > { %v961_v39 = vpop.f32.mrf.mxu1 }
 0x2fb   : > { %v1038_v42 = vmul.f32 %v2145_v36, %v961_v39  ;;  %v2871_v43 = vadd.f32 %v1056_v35, %v1040_v34  ;;  %v2163_v35 = vpop.eup %2162 }
 0x2fc   : > { %v2165_v37 = vpop.eup %2164 }
 0x2fd   : > { %v2875_v46 = vadd.f32 %v1054_v40, %v1038_v42  ;;  %v1086_v51 = vpack.c.bf16 %v2871_v43, %v2877_v48  ;;  %v2167_v39 = vpop.eup %2166  ;;  %v1068_v42 = vld [vmem:[%s2701_s22 + $0x78] sm:$0xff] }
 0x2fe   : > { %v2169_v44 = vpop.eup %2168 }
 0x2ff   : > { %v1872_v49 = vpop.f32.mrf.mxu1  ;;  %v1085_v50 = vpack.c.bf16 %v2875_v46, %v2873_v45 }
 0x300   : > { %v1043_v63 = vmul.f32 %v2151_v58, %v1872_v49  ;;  %v1065_v49 = vld [vmem:[%s2701_s22 + $0x60] sm:$0xff] }
 0x301   : > { %v974_v52 = vpop.f32.mrf.mxu1  ;;  %1898 = vmatprep.mubr.bf16.mxu1 %v1085_v50 }
 0x302   : > { %1899 = vmatmul.mubr.bf16.vlgmr.msra.gmra.mxu1 %v1086_v51  ;;  %v1041_v60 = vmul.f32 %v2147_v53, %v974_v52  ;;  %v2897_v9 = vadd.f32 %v1059_v3, %v1043_v63  ;;  %v1066_v51 = vld [vmem:[%s2701_s22 + $0x68] sm:$0xff]  ;;  %v1067_v52 = vld [vmem:[%s2701_s22 + $0x70] sm:$0xff]  ;;  %s2340_s22 = scalar_lea.vmem %s2339_s4, 4096 }
 0x303   : > { %v1873_v56 = vpop.f32.mrf.mxu1  ;;  %1954 = vmatpush3.bf16.msra.mxu1 %v2846_v10  ;;  %p2342_p3 = scmp.lt.s32.totalorder %s2340_s22, %s2334_s13 }
 0x304   : > { %v1044_v61 = vmul.f32 %v2149_v54, %v1873_v56  ;;  %1947 = vmatprep.subr.bf16.mxu1 %v2848_v11  ;;  %v2892_v7 = vadd.f32 %v1057_v0, %v1041_v60  ;;  %v2103_v60 = vld [vmem:[#allocation11 + $0x10] sm:$0xff]   ;;  %v1726_v0 = vld [vmem:[%s3060_s5] ss:$0 sm:$0xff] }
 0x305   : > { %v977_v1 = vpop.f32.mrf.mxu1  ;;  %1924 = vmatprep.subr.bf16.mxu0 %v2103_v60  ;;  %p2343_p0 = por %p2342_p3, %p2341_p13 }
 0x306   : > { %v1042_v4 = vmul.f32 %v2153_v62, %v977_v1  ;;  %v2889_v5 = vadd.f32 %v1060_v57, %v1044_v61  ;;  %1925 = vmatpush3.bf16.msra.mxu0 %v2103_v60  ;;  %v2104_v61 = vld [vmem:[#allocation11 + $0x8] sm:$0xff]   ;;  %v2105_v57 = vld [vmem:[#allocation11] sm:$0xff]  }
 0x307   : > { %v1876_v6 = vpop.f32.mrf.mxu1  ;;  %1955 = vmatpush3.bf16.msra.mxu1 %v2848_v11  ;;  %1926 = vmatprep.subr.bf16.mxu0 %v2104_v61  ;;  %p2344_p6 = pnand %p2343_p0, %p2337_p11 }
 0x308   : > { %v2894_v8 = vadd.f32 %v1058_v2, %v1042_v4  ;;  %1948 = vmatprep.subr.bf16.mxu1 %v2854_v12  ;;  %v1088_v18 = vpack.c.bf16 %v2889_v5, %v2897_v9  ;;  %v1047_v24 = vmul.f32 %v2159_v19, %v1876_v6 }
 0x309   : > { %v990_v10 = vpop.f32.mrf.mxu1 }
 0x30a   : > { %v1087_v16 = vpack.c.bf16 %v2894_v8, %v2892_v7  ;;  %v1045_v20 = vmul.f32 %v2155_v15, %v990_v10  ;;  %v2917_v33 = vadd.f32 %v1063_v28, %v1047_v24  ;;  %1927 = vmatpush3.bf16.msra.mxu0 %v2104_v61 }
 0x30b   : > { %v1877_v11 = vpop.f32.mrf.mxu1  ;;  %1956 = vmatpush3.bf16.msra.mxu1 %v2854_v12  ;;  %1928 = vmatprep.subr.bf16.mxu0 %v2105_v57 }
 0x30c   : > { %v1048_v21 = vmul.f32 %v2157_v17, %v1877_v11  ;;  %1902 = vmatprep.mubr.bf16.mxu1 %v1087_v16  ;;  %1949 = vmatprep.subr.bf16.mxu1 %v2858_v13  ;;  %v2912_v12 = vadd.f32 %v1061_v25, %v1045_v20 }
 0x30d   : > { %v993_v26 = vpop.f32.mrf.mxu1  ;;  %1903 = vmatmul.mubr.bf16.gmra.mxu1 %v1088_v18 }
 0x30e   : > { %v1046_v29 = vmul.f32 %v2161_v23, %v993_v26  ;;  %v2909_v30 = vadd.f32 %v1064_v22, %v1048_v21  ;;  %1929 = vmatpush3.bf16.msra.mxu0 %v2105_v57 }
 0x30f   : > { %v1880_v31 = vpop.f32.mrf.mxu1  ;;  %1957 = vmatpush3.bf16.msra.mxu1 %v2858_v13 }
 0x310   : > { %v2914_v32 = vadd.f32 %v1062_v27, %v1046_v29  ;;  %1950 = vmatprep.subr.bf16.mxu1 %v2862_v14  ;;  %v1090_v13 = vpack.c.bf16 %v2909_v30, %v2917_v33  ;;  %v1051_v47 = vmul.f32 %v2167_v39, %v1880_v31 }
 0x311   : > { %v1006_v34 = vpop.f32.mrf.mxu1 }
 0x312   : > { %v1089_v36 = vpack.c.bf16 %v2914_v32, %v2912_v12  ;;  %v1049_v40 = vmul.f32 %v2163_v35, %v1006_v34 }
 0x313   : > { %v1881_v38 = vpop.f32.mrf.mxu1  ;;  %1958 = vmatpush3.bf16.msra.mxu1 %v2862_v14  ;;  %v2934_v14 = vadd.f32 %v1067_v52, %v1051_v47 }
 0x314   : > { %v1052_v41 = vmul.f32 %v2165_v37, %v1881_v38  ;;  %1906 = vmatprep.mubr.bf16.mxu1 %v1089_v36  ;;  %v2930_v55 = vadd.f32 %v1065_v49, %v1049_v40  ;;  %1951 = vmatprep.subr.bf16.mxu1 %v2103_v60 }
 0x315   : > { %v1009_v50 = vpop.f32.mrf.mxu1  ;;  %1907 = vmatmul.mubr.bf16.gmra.mxu1 %v1090_v13 }
 0x316   : > { %v1050_v53 = vmul.f32 %v2169_v44, %v1009_v50  ;;  %v2928_v54 = vadd.f32 %v1068_v42, %v1052_v41 }
 0x317   : > { %1959 = vmatpush3.bf16.msra.mxu1 %v2103_v60 }
 0x318   : > { %v2932_v56 = vadd.f32 %v1066_v51, %v1050_v53  ;;  %v1092_v59 = vpack.c.bf16 %v2928_v54, %v2934_v14  ;;  %1952 = vmatprep.subr.bf16.mxu1 %v2104_v61 }
 0x31a   : > { %v1091_v58 = vpack.c.bf16 %v2932_v56, %v2930_v55 }
 0x31b   : > { %1960 = vmatpush3.bf16.msra.mxu1 %v2104_v61 }
 0x31c   : > { %1910 = vmatprep.mubr.bf16.mxu1 %v1091_v58  ;;  %1953 = vmatprep.subr.bf16.mxu1 %v2105_v57 }
 0x31d   : > { %1911 = vmatmul.mubr.bf16.gmra.mxu1 %v1092_v59 }
 0x31f   : > { %1961 = vmatpush3.bf16.msra.mxu1 %v2105_v57 }
 0x3c2   : > { %v1900_v62 = vpop.f32.mrf.mxu1 }
 0x3c3   : > { %v1207_v4 = vadd.f32 %v1900_v62, %v1726_v0 }
 0x3c4   : > { %v1198_v63 = vpop.f32.mrf.mxu1 }
 0x3c5   : > { %v1199_v2 = vadd.f32 %v1726_v0, %v1198_v63  ;;  %v1263_v11 = vmax.f32 %v1207_v4, 0.0 }
 0x3c6   : > { %v1901_v1 = vpop.f32.mrf.mxu1 }
 0x3c7   : > { %v1210_v3 = vadd.f32 %v1901_v1, %v1726_v0  ;;  %v1261_v16 = vmax.f32 %v1199_v2, 0.0 }
 0x3c8   : > { %v1201_v6 = vpop.f32.mrf.mxu1 }
 0x3c9   : > { %v1202_v10 = vadd.f32 %v1726_v0, %v1201_v6  ;;  %v1264_v15 = vmax.f32 %v1210_v3, 0.0 }
 0x3cb   : > { %v1262_v17 = vmax.f32 %v1202_v10, 0.0  ;;  %v1278_v20 = vpack.c.bf16 %v1264_v15, %v1263_v11 }
 0x3cd   : > { %v1277_v18 = vpack.c.bf16 %v1262_v17, %v1261_v16  ;;  %v1904_v19 = vpop.f32.mrf.mxu1  ;;  %v2946_v16 = vld [vmem:[%s3062_s7] ss:$0 sm:$0xff] }
 0x3ce   : > { %v1223_v25 = vadd.f32 %v1904_v19, %v1726_v0 }
 0x3cf   : > { %v1214_v21 = vpop.f32.mrf.mxu1  ;;  %1930 = vmatprep.mubr.bf16.mxu0 %v1277_v18 }
 0x3d0   : > { %1931 = vmatmul.mubr.bf16.vlgmr.msra.gmra.mxu0 %v1278_v20  ;;  %v1215_v23 = vadd.f32 %v1726_v0, %v1214_v21  ;;  %v1267_v35 = vmax.f32 %v1223_v25, 0.0 }
 0x3d1   : > { %v1905_v22 = vpop.f32.mrf.mxu1 }
 0x3d2   : > { %v1226_v24 = vadd.f32 %v1905_v22, %v1726_v0  ;;  %v1265_v31 = vmax.f32 %v1215_v23, 0.0 }
 0x3d3   : > { %v1217_v26 = vpop.f32.mrf.mxu1 }
 0x3d4   : > { %v1218_v27 = vadd.f32 %v1726_v0, %v1217_v26  ;;  %v1268_v28 = vmax.f32 %v1226_v24, 0.0 }
 0x3d5   : > { %v1908_v29 = vpop.f32.mrf.mxu1 }
 0x3d6   : > { %v1266_v34 = vmax.f32 %v1218_v27, 0.0  ;;  %v1280_v38 = vpack.c.bf16 %v1268_v28, %v1267_v35  ;;  %v1239_v41 = vadd.f32 %v1908_v29, %v1726_v0 }
 0x3d7   : > { %v1230_v36 = vpop.f32.mrf.mxu1 }
 0x3d8   : > { %v1279_v37 = vpack.c.bf16 %v1266_v34, %v1265_v31  ;;  %v1231_v39 = vadd.f32 %v1726_v0, %v1230_v36  ;;  %v1271_v52 = vmax.f32 %v1239_v41, 0.0 }
 0x3d9   : > { %v1909_v13 = vpop.f32.mrf.mxu1 }
 0x3da   : > { %v1242_v40 = vadd.f32 %v1909_v13, %v1726_v0  ;;  %1934 = vmatprep.mubr.bf16.mxu0 %v1279_v37  ;;  %v1269_v50 = vmax.f32 %v1231_v39, 0.0 }
 0x3db   : > { %v1233_v42 = vpop.f32.mrf.mxu1  ;;  %1935 = vmatmul.mubr.bf16.gmra.mxu0 %v1280_v38 }
 0x3dc   : > { %v1234_v44 = vadd.f32 %v1726_v0, %v1233_v42  ;;  %v1272_v47 = vmax.f32 %v1242_v40, 0.0 }
 0x3dd   : > { %v1912_v49 = vpop.f32.mrf.mxu1 }
 0x3de   : > { %v1270_v51 = vmax.f32 %v1234_v44, 0.0  ;;  %v1282_v59 = vpack.c.bf16 %v1272_v47, %v1271_v52  ;;  %v1255_v62 = vadd.f32 %v1912_v49, %v1726_v0 }
 0x3df   : > { %v1246_v53 = vpop.f32.mrf.mxu1 }
 0x3e0   : > { %v1281_v58 = vpack.c.bf16 %v1270_v51, %v1269_v50  ;;  %v1247_v61 = vadd.f32 %v1726_v0, %v1246_v53  ;;  %v1275_v6 = vmax.f32 %v1255_v62, 0.0 }
 0x3e1   : > { %v1913_v60 = vpop.f32.mrf.mxu1 }
 0x3e2   : > { %v1258_v57 = vadd.f32 %v1913_v60, %v1726_v0  ;;  %1938 = vmatprep.mubr.bf16.mxu1 %v1281_v58  ;;  %v1273_v3 = vmax.f32 %v1247_v61, 0.0 }
 0x3e3   : > { %v1249_v63 = vpop.f32.mrf.mxu1  ;;  %1939 = vmatmul.mubr.bf16.vlgmr.msra.gmra.mxu1 %v1282_v59 }
 0x3e4   : > { %v1250_v1 = vadd.f32 %v1726_v0, %v1249_v63  ;;  %v1276_v2 = vmax.f32 %v1258_v57, 0.0 }
 0x3e6   : > { %v1274_v4 = vmax.f32 %v1250_v1, 0.0  ;;  %v1284_v15 = vpack.c.bf16 %v1276_v2, %v1275_v6 }
 0x3e8   : > { %v1283_v10 = vpack.c.bf16 %v1274_v4, %v1273_v3 }
 0x3ea   : > { %1942 = vmatprep.mubr.bf16.mxu1 %v1283_v10 }
 0x3eb   : > { %1943 = vmatmul.mubr.bf16.gmra.mxu1 %v1284_v15 }
 0x490   : > { %v1932_v17 = vpop.f32.mrf.mxu0 }
 0x491   : > { %v1399_v11 = vadd.f32 %v1932_v17, %v2946_v16 }
 0x492   : > { %v1390_v18 = vpop.f32.mrf.mxu0 }
 0x493   : > { %v1455_v0 = vadd.f32 %v1399_v11, %v2877_v48  ;;  %v1391_v19 = vadd.f32 %v2946_v16, %v1390_v18 }
 0x494   : > { %v1933_v20 = vpop.f32.mrf.mxu0 }
 0x495   : > { %1471 = vst [vmem:[%s2953_s23 + $0x10] sm:$0xff] %v1455_v0  ;;  %v1453_v21 = vadd.f32 %v1391_v19, %v2873_v45  ;;  %v1402_v22 = vadd.f32 %v1933_v20, %v2946_v16 }
 0x496   : > { %v1393_v23 = vpop.f32.mrf.mxu0 }
 0x497   : > { %1469 = vst [vmem:[%s2953_s23] sm:$0xff] %v1453_v21  ;;  %v1456_v48 = vadd.f32 %v1402_v22, %v2871_v43  ;;  %v1394_v24 = vadd.f32 %v2946_v16, %v1393_v23 }
 0x499   : > { %1472 = vst [vmem:[%s2953_s23 + $0x18] sm:$0xff] %v1456_v48  ;;  %v1454_v25 = vadd.f32 %v1394_v24, %v2875_v46 }
 0x49b   : > { %1470 = vst [vmem:[%s2953_s23 + $0x8] sm:$0xff] %v1454_v25  ;;  %v1936_v26 = vpop.f32.mrf.mxu0 }
 0x49c   : > { %v1415_v27 = vadd.f32 %v1936_v26, %v2946_v16 }
 0x49d   : > { %v1406_v28 = vpop.f32.mrf.mxu0 }
 0x49e   : > { %v1459_v45 = vadd.f32 %v1415_v27, %v2897_v9  ;;  %v1407_v29 = vadd.f32 %v2946_v16, %v1406_v28 }
 0x49f   : > { %v1937_v31 = vpop.f32.mrf.mxu0 }
 0x4a0   : > { %1475 = vst [vmem:[%s2953_s23 + $0x30] sm:$0xff] %v1459_v45  ;;  %v1457_v43 = vadd.f32 %v1407_v29, %v2892_v7  ;;  %v1418_v34 = vadd.f32 %v1937_v31, %v2946_v16 }
 0x4a1   : > { %v1409_v35 = vpop.f32.mrf.mxu0 }
 0x4a2   : > { %1473 = vst [vmem:[%s2953_s23 + $0x20] sm:$0xff] %v1457_v43  ;;  %v1460_v46 = vadd.f32 %v1418_v34, %v2889_v5  ;;  %v1410_v36 = vadd.f32 %v2946_v16, %v1409_v35 }
 0x4a3   : > { %v1940_v37 = vpop.f32.mrf.mxu1 }
 0x4a4   : > { %1476 = vst [vmem:[%s2953_s23 + $0x38] sm:$0xff] %v1460_v46  ;;  %v1458_v9 = vadd.f32 %v1410_v36, %v2894_v8  ;;  %v1431_v38 = vadd.f32 %v1940_v37, %v2946_v16 }
 0x4a5   : > { %v1422_v13 = vpop.f32.mrf.mxu1 }
 0x4a6   : > { %1474 = vst [vmem:[%s2953_s23 + $0x28] sm:$0xff] %v1458_v9  ;;  %v1463_v7 = vadd.f32 %v1431_v38, %v2917_v33  ;;  %v1423_v39 = vadd.f32 %v2946_v16, %v1422_v13 }
 0x4a7   : > { %v1941_v40 = vpop.f32.mrf.mxu1 }
 0x4a8   : > { %1479 = vst [vmem:[%s2953_s23 + $0x50] sm:$0xff] %v1463_v7  ;;  %v1461_v5 = vadd.f32 %v1423_v39, %v2912_v12  ;;  %v1434_v41 = vadd.f32 %v1941_v40, %v2946_v16 }
 0x4a9   : > { %v1425_v42 = vpop.f32.mrf.mxu1 }
 0x4aa   : > { %1477 = vst [vmem:[%s2953_s23 + $0x40] sm:$0xff] %v1461_v5  ;;  %v1464_v8 = vadd.f32 %v1434_v41, %v2909_v30  ;;  %v1426_v44 = vadd.f32 %v2946_v16, %v1425_v42 }
 0x4ab   : > { %v1944_v47 = vpop.f32.mrf.mxu1 }
 0x4ac   : > { %1480 = vst [vmem:[%s2953_s23 + $0x58] sm:$0xff] %v1464_v8  ;;  %v1462_v33 = vadd.f32 %v1426_v44, %v2914_v32  ;;  %v1447_v49 = vadd.f32 %v1944_v47, %v2946_v16 }
 0x4ad   : > { %v1438_v50 = vpop.f32.mrf.mxu1 }
 0x4ae   : > { %1478 = vst [vmem:[%s2953_s23 + $0x48] sm:$0xff] %v1462_v33  ;;  %v1467_v12 = vadd.f32 %v1447_v49, %v2934_v14  ;;  %v1439_v51 = vadd.f32 %v2946_v16, %v1438_v50 }
 0x4af   : > { %v1945_v52 = vpop.f32.mrf.mxu1 }
 0x4b0   : > { %1483 = vst [vmem:[%s2953_s23 + $0x70] sm:$0xff] %v1467_v12  ;;  %v1465_v30 = vadd.f32 %v1439_v51, %v2930_v55  ;;  %v1450_v53 = vadd.f32 %v1945_v52, %v2946_v16 }
 0x4b1   : > { %v1441_v32 = vpop.f32.mrf.mxu1 }
 0x4b2   : > { %1481 = vst [vmem:[%s2953_s23 + $0x60] sm:$0xff] %v1465_v30  ;;  %v1468_v58 = vadd.f32 %v1450_v53, %v2928_v54  ;;  %v1442_v59 = vadd.f32 %v2946_v16, %v1441_v32 }
 0x4b4   : > { %1484 = vst [vmem:[%s2953_s23 + $0x78] sm:$0xff] %v1468_v58  ;;  %v1466_v55 = vadd.f32 %v1442_v59, %v2932_v56 }
 0x4b6   : > { %1482 = vst [vmem:[%s2953_s23 + $0x68] sm:$0xff] %v1466_v55 }
 0x4b7   : > { %2347 = shalt.err (!%p2344_p6)
}
 0x4b8   : > { %s2348_s16 = scalar_lea.hbm %s3002_s2, 2048  ;;  %s2352_s11 = scalar_lea.hbm %s3109_s25, 4096 }
 0x4b9   : > { %p2349_p1 = scmp.ne.s32.totalorder %s3002_s2, %s2348_s16  ;;  %p2353_p9 = scmp.lt.s32.totalorder %s3002_s2, %s3109_s25 }
 0x4ba   : > { %p2354_p5 = scmp.lt.s32.totalorder %s2352_s11, %s2348_s16 }
 0x4bb   : > { %p2350_p2 = pnand %p2349_p1, %p2542_p8 }
 0x4bc   : > { %p2355_p4 = por %p2354_p5, %p2353_p9 }
 0x4bd   : > { %p2351_p12 = pneg %p2350_p2 }
 0x4bf   : > { %p2356_p7 = pnand %p2355_p4, %p2351_p12 }
 0x4c1   : > { %2359 = shalt.err (!%p2356_p7)
}
 0x4c2   : > { %s2443_s21 = smov 128   ;;  %s2444_s23 = smov 8  }
 0x4c3   : > { %1978 = dma.vmem_to_hbm [thread:$0]  (%p2542_p8), %s3004_s1, 2048, %s3002_s2, %s1486_s30, %s2443_s21, %s2443_s21, %s2444_s23  }
 0x4c4 PF: > { %s3110_s0 = sld [smem:[#allocation20_spill]]  ;;  %p3113_p11 = scmp.ge.s32.totalorder %s2430_s10, 2 }
 0x4c5   : > { %s3111_s27 = sld [smem:[#allocation23_spill]] }
 0x4ca   : > { %s1516_s14 = sand.u32 1, %s3110_s0  }
 0x4cb   : > { %p3112_p10 = scmp.ne.s32.totalorder %s3111_s27, 0  ;;  %s1517_s24 = scalar_lea.sflag [#allocation4], %s1516_s14 }
 0x4cd   : > { %p2001_p13 = pnand %p3113_p11, %p3112_p10 }
 0x4cf   : > { %p2002_p3 = pneg %p2001_p13 }
 0x4d1   : > { %2405 = dma.done.wait (%p2002_p3), %s1517_s24, 2048  }
 0x4d2   : > { %2407 = vsyncadd (%p2002_p3), %s1517_s24, 4294965248  ;;  %s31_s10 = sadd.s32 1, %s2430_s10   ;;  %s3114_s12 = sld [smem:[#allocation24_spill]] }
 0x4d3   : > { %p28_p0 = scmp.ge.s32.totalorder %s31_s10, 4   ;;  %s3115_s27 = smov %s2414_s28 }
 0x4d4   : > { %s3116_s28 = smov %s2418_s29  ;;  %s3117_s29 = smov %s2607_s19 }
 0x4d5   : > { %s3118_s30 = smov %s2426_s9  ;;  %30 = sbr.rel (!%p28_p0) target bundleno = 17 (0x11), region = 142 }
 0x4d8   : > { %s3119_s9 = smov %s3114_s12 }
 0x4da   :  { %1522 = vsyncpa [#allocation3], 1 }
 0x4db   :  { %1524 = vsyncpa [#allocation3 + $0x1], 1 }
 0x4dc   :  { %1525 = vsyncpa [#allocation6], 1 }
 0x4dd   :  { %1527 = vsyncpa [#allocation6 + $0x1], 1 }
 0x4de   :  { %1528 = vsyncpa [#allocation9], 1 }
 0x4df   :  { %1530 = vsyncpa [#allocation9 + $0x1], 1 }
 0x4e0   :  { %1531 = vsyncpa [#allocation12], 1 }
 0x4e1   :  { %1532 = vsyncpa [#allocation4], 1 }
 0x4e2   :  { %1534 = vsyncpa [#allocation4 + $0x1], 1 }

</bundles_post_ra>
